<compile_context>
chip_gen: v7x
topology: tpu7x:2x2x1
jax: 0.10.0
libtpu: 0.0.40
codegen_flags: <defaults>
</compile_context>

<pallas_src>
import functools

import jax
import jax.numpy as jnp
from jax.experimental import pallas as pl
from jax.experimental.pallas import tpu as pltpu

HIGHEST = jax.lax.Precision.HIGHEST
BN_EPS = 1e-5


def _round_up(x, m):
    return (x + m - 1) // m * m


# ----------------------------------------------------------------------------
# Fused kernel: conv3x3 (one im2col MXU matmul) + BatchNorm (batch statistics,
# biased variance — PyTorch training mode) + SE attention + multiply.
# Whole (padded) problem fits comfortably in VMEM at these shapes, so this is
# a single grid-less invocation.
# TODO(synk): for large N*H*W*C that no longer fits v7x's 64 MiB VMEM this
# needs a batch/spatial grid with a two-pass BN (sum / sum-of-squares pass,
# then normalize+attend pass).
# ----------------------------------------------------------------------------
def fused_da_kernel(xcol_ref, w_ref, b_ref, gamma_ref, beta_ref,
                    w1_ref, b1_ref, w2_ref, b2_ref, o_ref, *, N, HW):
    # xcol_ref : (N*HW, KP)  im2col patches   (KP = 9*Cin padded to 128)
    # w_ref    : (KP, CP)    conv weight      (CP = Cout padded to 128)
    # b/gamma/beta/b2 : (1, CP);  w1 : (CP, Cmid);  b1 : (1, Cmid);  w2 : (Cmid, CP)
    # o_ref    : (N, HW, CP) lane-dense output

    # --- conv3x3 as a single matmul; default precision (bf16 MXU passes,
    #     f32 accumulation) instead of HIGHEST.
    conv = jnp.dot(xcol_ref[...], w_ref[...],
                   preferred_element_type=jnp.float32)
    conv = conv + b_ref[...]                                    # (N*HW, CP)

    # --- BatchNorm2d over (N, H, W) per channel (training-mode batch stats).
    mean = jnp.mean(conv, axis=0, keepdims=True)                # (1, CP)
    centered = conv - mean
    var = jnp.mean(centered * centered, axis=0, keepdims=True)
    scale = jax.lax.rsqrt(var + BN_EPS) * gamma_ref[...]        # hoisted (1, CP)
    yhat = centered * scale + beta_ref[...]                     # (N*HW, CP)

    # --- SE attention on the normalized features.
    yhat3 = yhat.reshape(N, HW, -1)                             # (N, HW, CP)
    pooled = jnp.mean(yhat3, axis=1)                            # (N, CP)
    h1 = jnp.dot(pooled, w1_ref[...],
                 preferred_element_type=jnp.float32)
    h1 = jnp.maximum(h1 + b1_ref[...], 0.0)                     # ReLU, (N, Cmid)
    logits = jnp.dot(h1, w2_ref[...],
                     preferred_element_type=jnp.float32)
    logits = logits + b2_ref[...]                               # (N, CP)
    # sigmoid(x) == 0.5*(tanh(x/2)+1): exact, EUP tanh, no inf intermediates.
    att = 0.5 * (jnp.tanh(0.5 * logits) + 1.0)

    o_ref[...] = yhat3 * att[:, None, :]


# ----------------------------------------------------------------------------
# Wrapper (XLA glue: layout, padding, im2col, channel padding to 128)
# ----------------------------------------------------------------------------
def domain_adaptation_forward(x_nchw, params):
    """x_nchw: (N, Cin, H, W) float32. Returns (N, Cout, H, W) float32."""
    w_conv, b_conv, gamma, beta, w1, b1, w2, b2 = params
    N, Cin, H, W = x_nchw.shape
    K = 9 * Cin
    Cout = w_conv.shape[-1]
    HW = H * W

    KP = _round_up(K, 128)        # lane-dense im2col / conv-weight K dim
    CP = _round_up(Cout, 128)     # lane-dense channel dim

    # NCHW -> NHWC, zero pad H/W by 1, build im2col patch matrix.
    x = jnp.transpose(x_nchw, (0, 2, 3, 1))
    xp = jnp.pad(x, ((0, 0), (1, 1), (1, 1), (0, 0)))
    taps = [xp[:, dy:dy + H, dx:dx + W, :]
            for dy in range(3) for dx in range(3)]   # tap order matches weight rows
    xcol = jnp.concatenate(taps, axis=-1).reshape(N * HW, K)

    # Zero-pad K and channel dims to multiples of 128 (inert for the math).
    xcol_p = jnp.pad(xcol, ((0, 0), (0, KP - K)))
    w_p = jnp.pad(w_conv, ((0, KP - K), (0, CP - Cout)))
    b_p = jnp.pad(b_conv, ((0, 0), (0, CP - Cout)))
    gamma_p = jnp.pad(gamma, ((0, 0), (0, CP - Cout)))
    beta_p = jnp.pad(beta, ((0, 0), (0, CP - Cout)))
    w1_p = jnp.pad(w1, ((0, CP - Cout), (0, 0)))
    w2_p = jnp.pad(w2, ((0, 0), (0, CP - Cout)))
    b2_p = jnp.pad(b2, ((0, 0), (0, CP - Cout)))

    out3 = pl.pallas_call(
        functools.partial(fused_da_kernel, N=N, HW=HW),
        out_shape=jax.ShapeDtypeStruct((N, HW, CP), jnp.float32),
        compiler_params=pltpu.CompilerParams(
            vmem_limit_bytes=32 * 1024 * 1024),
    )(xcol_p, w_p, b_p, gamma_p, beta_p, w1_p, b1, w2_p, b2_p)

    out = out3[:, :, :Cout].reshape(N, H, W, Cout)
    return jnp.transpose(out, (0, 3, 1, 2))  # back to NCHW


# ----------------------------------------------------------------------------
# Deterministic parameter init (shapes from the PyTorch __init__)
# ----------------------------------------------------------------------------
def init_params(key, in_channels, out_channels):
    Cmid = out_channels // 16
    k = jax.random.split(key, 8)
    fan_conv = in_channels * 9
    bnd = 1.0 / jnp.sqrt(fan_conv)
    # conv weight stored as (KH*KW*Cin, Cout)  (taps ordered dy-major, dx, cin)
    w_conv = jax.random.uniform(k[0], (9 * in_channels, out_channels),
                                jnp.float32, -bnd, bnd)
    b_conv = jax.random.uniform(k[1], (1, out_channels), jnp.float32, -bnd, bnd)
    gamma = 1.0 + 0.1 * jax.random.normal(k[2], (1, out_channels), jnp.float32)
    beta = 0.1 * jax.random.normal(k[3], (1, out_channels), jnp.float32)
    bnd1 = 1.0 / jnp.sqrt(out_channels)
    w1 = jax.random.uniform(k[4], (out_channels, Cmid), jnp.float32, -bnd1, bnd1)
    b1 = jax.random.uniform(k[5], (1, Cmid), jnp.float32, -bnd1, bnd1)
    bnd2 = 1.0 / jnp.sqrt(Cmid)
    w2 = jax.random.uniform(k[6], (Cmid, out_channels), jnp.float32, -bnd2, bnd2)
    b2 = jax.random.uniform(k[7], (1, out_channels), jnp.float32, -bnd2, bnd2)
    return (w_conv, b_conv, gamma, beta, w1, b1, w2, b2)


# ----------------------------------------------------------------------------
# Pure-JAX reference (mirrors PyTorch forward in training mode, f32/HIGHEST)
# ----------------------------------------------------------------------------
def reference_forward(x_nchw, params):
    w_conv, b_conv, gamma, beta, w1, b1, w2, b2 = params
    N, Cin, H, W = x_nchw.shape
    Cout = w_conv.shape[-1]
    x = jnp.transpose(x_nchw, (0, 2, 3, 1))
    x_pad = jnp.pad(x, ((0, 0), (1, 1), (1, 1), (0, 0)))
    conv = jnp.zeros((N, H, W, Cout), jnp.float32)
    for dy in range(3):
        for dx in range(3):
            patch = x_pad[:, dy:dy + H, dx:dx + W, :]
            wk = w_conv[(dy * 3 + dx) * Cin:(dy * 3 + dx + 1) * Cin, :]
            conv = conv + jnp.einsum('nhwc,cd->nhwd', patch, wk,
                                     precision=HIGHEST)
    conv = conv + b_conv[0]
    mean = jnp.mean(conv, axis=(0, 1, 2), keepdims=True)
    var = jnp.mean((conv - mean) ** 2, axis=(0, 1, 2), keepdims=True)
    yhat = (conv - mean) / jnp.sqrt(var + BN_EPS) * gamma[0] + beta[0]
    pooled = jnp.mean(yhat, axis=(1, 2))                         # (N, Cout)
    h1 = jnp.maximum(pooled @ w1 + b1[0], 0.0)
    att = jax.nn.sigmoid(h1 @ w2 + b2[0])                        # (N, Cout)
    out = yhat * att[:, None, None, :]
    return jnp.transpose(out, (0, 3, 1, 2))


if __name__ == "__main__":
    key = jax.random.PRNGKey(0)
    kx, kp = jax.random.split(key)

    N, Cin, Cout, H, W = 2, 4, 32, 16, 16   # Cout//16 = 2 attention bottleneck
    x = jax.random.normal(kx, (N, Cin, H, W), jnp.float32)
    params = init_params(kp, Cin, Cout)

    out = domain_adaptation_forward(x, params)
    out = jax.block_until_ready(out)

    ref = reference_forward(x, params)
    assert out.shape == (N, Cout, H, W)
    # Tolerance widened vs. the f32/HIGHEST reference: the kernel now uses the
    # default MXU precision (bf16 multiply passes, f32 accumulation) per the
    # v6e/v7x performance guidance.
    assert jnp.allclose(out, ref, rtol=3e-2, atol=3e-2), \
        float(jnp.max(jnp.abs(out - ref)))

    print("KERNEL_OK")
</pallas_src>

<mosaic_0001>
module attributes {stable_mosaic.version = 11 : i64} {
  func.func @fused_da_kernel(%arg0: memref<512x128xf32, #tpu.memory_space<vmem>>, %arg1: memref<128x128xf32, #tpu.memory_space<vmem>>, %arg2: memref<1x128xf32, #tpu.memory_space<vmem>>, %arg3: memref<1x128xf32, #tpu.memory_space<vmem>>, %arg4: memref<1x128xf32, #tpu.memory_space<vmem>>, %arg5: memref<128x2xf32, #tpu.memory_space<vmem>>, %arg6: memref<1x2xf32, #tpu.memory_space<vmem>>, %arg7: memref<2x128xf32, #tpu.memory_space<vmem>>, %arg8: memref<1x128xf32, #tpu.memory_space<vmem>>, %arg9: memref<2x256x128xf32, #tpu.memory_space<vmem>>) attributes {dimension_semantics = [], scalar_prefetch = 0 : i64, scratch_operands = 0 : i64, tpu.core_type = #tpu.core_type<tc>} {
    %c0 = arith.constant 0 : index
    %c0_0 = arith.constant 0 : index
    %0 = vector.load %arg0[%c0, %c0_0] : memref<512x128xf32, #tpu.memory_space<vmem>>, vector<512x128xf32>
    %c0_1 = arith.constant 0 : index
    %c0_2 = arith.constant 0 : index
    %1 = vector.load %arg1[%c0_1, %c0_2] : memref<128x128xf32, #tpu.memory_space<vmem>>, vector<128x128xf32>
    %cst = arith.constant dense<0.000000e+00> : vector<512x128xf32>
    %2 = tpu.matmul %0, %1, %cst {dimension_numbers = #tpu.dot_dimension_numbers<[1], [0], [0], [1], [0, 0, 1, 1], [], []>} : vector<512x128xf32>, vector<128x128xf32>, vector<512x128xf32> -> vector<512x128xf32>
    %c0_3 = arith.constant 0 : index
    %c0_4 = arith.constant 0 : index
    %3 = vector.load %arg2[%c0_3, %c0_4] : memref<1x128xf32, #tpu.memory_space<vmem>>, vector<1x128xf32>
    %4 = vector.broadcast %3 : vector<1x128xf32> to vector<512x128xf32>
    %5 = arith.addf %2, %4 : vector<512x128xf32>
    %cst_5 = arith.constant dense<0.000000e+00> : vector<128xf32>
    %6 = vector.multi_reduction <add>, %5, %cst_5 [0] : vector<512x128xf32> to vector<128xf32>
    %7 = vector.shape_cast %6 : vector<128xf32> to vector<1x128xf32>
    %cst_6 = arith.constant 5.120000e+02 : f32
    %8 = vector.broadcast %cst_6 : f32 to vector<1x128xf32>
    %9 = arith.divf %7, %8 : vector<1x128xf32>
    %10 = vector.broadcast %9 : vector<1x128xf32> to vector<512x128xf32>
    %11 = arith.subf %5, %10 : vector<512x128xf32>
    %12 = arith.mulf %11, %11 : vector<512x128xf32>
    %cst_7 = arith.constant dense<0.000000e+00> : vector<128xf32>
    %13 = vector.multi_reduction <add>, %12, %cst_7 [0] : vector<512x128xf32> to vector<128xf32>
    %14 = vector.shape_cast %13 : vector<128xf32> to vector<1x128xf32>
    %cst_8 = arith.constant 5.120000e+02 : f32
    %15 = vector.broadcast %cst_8 : f32 to vector<1x128xf32>
    %16 = arith.divf %14, %15 : vector<1x128xf32>
    %cst_9 = arith.constant 9.99999974E-6 : f32
    %17 = vector.broadcast %cst_9 : f32 to vector<1x128xf32>
    %18 = arith.addf %16, %17 : vector<1x128xf32>
    %19 = math.rsqrt %18 : vector<1x128xf32>
    %c0_10 = arith.constant 0 : index
    %c0_11 = arith.constant 0 : index
    %20 = vector.load %arg3[%c0_10, %c0_11] : memref<1x128xf32, #tpu.memory_space<vmem>>, vector<1x128xf32>
    %21 = arith.mulf %19, %20 : vector<1x128xf32>
    %22 = vector.broadcast %21 : vector<1x128xf32> to vector<512x128xf32>
    %23 = arith.mulf %11, %22 : vector<512x128xf32>
    %c0_12 = arith.constant 0 : index
    %c0_13 = arith.constant 0 : index
    %24 = vector.load %arg4[%c0_12, %c0_13] : memref<1x128xf32, #tpu.memory_space<vmem>>, vector<1x128xf32>
    %25 = vector.broadcast %24 : vector<1x128xf32> to vector<512x128xf32>
    %26 = arith.addf %23, %25 : vector<512x128xf32>
    %27 = vector.shape_cast %26 : vector<512x128xf32> to vector<2x256x128xf32>
    %cst_14 = arith.constant dense<0.000000e+00> : vector<2x128xf32>
    %28 = vector.multi_reduction <add>, %27, %cst_14 [1] : vector<2x256x128xf32> to vector<2x128xf32>
    %cst_15 = arith.constant 2.560000e+02 : f32
    %29 = vector.broadcast %cst_15 : f32 to vector<2x128xf32>
    %30 = arith.divf %28, %29 : vector<2x128xf32>
    %c0_16 = arith.constant 0 : index
    %c0_17 = arith.constant 0 : index
    %31 = vector.load %arg5[%c0_16, %c0_17] : memref<128x2xf32, #tpu.memory_space<vmem>>, vector<128x2xf32>
    %cst_18 = arith.constant dense<0.000000e+00> : vector<2x2xf32>
    %32 = tpu.matmul %30, %31, %cst_18 {dimension_numbers = #tpu.dot_dimension_numbers<[1], [0], [0], [1], [0, 0, 1, 1], [], []>} : vector<2x128xf32>, vector<128x2xf32>, vector<2x2xf32> -> vector<2x2xf32>
    %c0_19 = arith.constant 0 : index
    %c0_20 = arith.constant 0 : index
    %33 = vector.load %arg6[%c0_19, %c0_20] : memref<1x2xf32, #tpu.memory_space<vmem>>, vector<1x2xf32>
    %34 = vector.broadcast %33 : vector<1x2xf32> to vector<2x2xf32>
    %35 = arith.addf %32, %34 : vector<2x2xf32>
    %cst_21 = arith.constant 0.000000e+00 : f32
    %36 = vector.broadcast %cst_21 : f32 to vector<2x2xf32>
    %37 = arith.maximumf %35, %36 : vector<2x2xf32>
    %c0_22 = arith.constant 0 : index
    %c0_23 = arith.constant 0 : index
    %38 = vector.load %arg7[%c0_22, %c0_23] : memref<2x128xf32, #tpu.memory_space<vmem>>, vector<2x128xf32>
    %cst_24 = arith.constant dense<0.000000e+00> : vector<2x128xf32>
    %39 = tpu.matmul %37, %38, %cst_24 {dimension_numbers = #tpu.dot_dimension_numbers<[1], [0], [0], [1], [0, 0, 1, 1], [], []>} : vector<2x2xf32>, vector<2x128xf32>, vector<2x128xf32> -> vector<2x128xf32>
    %c0_25 = arith.constant 0 : index
    %c0_26 = arith.constant 0 : index
    %40 = vector.load %arg8[%c0_25, %c0_26] : memref<1x128xf32, #tpu.memory_space<vmem>>, vector<1x128xf32>
    %41 = vector.broadcast %40 : vector<1x128xf32> to vector<2x128xf32>
    %42 = arith.addf %39, %41 : vector<2x128xf32>
    %cst_27 = arith.constant 5.000000e-01 : f32
    %43 = vector.broadcast %cst_27 : f32 to vector<2x128xf32>
    %44 = arith.mulf %43, %42 : vector<2x128xf32>
    %45 = math.tanh %44 : vector<2x128xf32>
    %cst_28 = arith.constant 1.000000e+00 : f32
    %46 = vector.broadcast %cst_28 : f32 to vector<2x128xf32>
    %47 = arith.addf %45, %46 : vector<2x128xf32>
    %cst_29 = arith.constant 5.000000e-01 : f32
    %48 = vector.broadcast %cst_29 : f32 to vector<2x128xf32>
    %49 = arith.mulf %48, %47 : vector<2x128xf32>
    %50 = vector.shape_cast %49 : vector<2x128xf32> to vector<2x1x128xf32>
    %51 = vector.broadcast %50 : vector<2x1x128xf32> to vector<2x256x128xf32>
    %52 = arith.mulf %27, %51 : vector<2x256x128xf32>
    %c0_30 = arith.constant 0 : index
    %c0_31 = arith.constant 0 : index
    %c0_32 = arith.constant 0 : index
    %53 = vector.load %arg9[%c0_30, %c0_31, %c0_32] : memref<2x256x128xf32, #tpu.memory_space<vmem>>, vector<2x256x128xf32>
    tpu.vector_store %arg9[%c0_30, %c0_31, %c0_32], %52 {strides = array<i32>} : memref<2x256x128xf32, #tpu.memory_space<vmem>>, vector<2x256x128xf32>,
    return
  }
}

</mosaic_0001>

<bundles_post_ra>
// kernel: tpu_custom_call.1
= control target key start
LH: loop header
LB: loop body
LE: loop exit
PB: predicated region body
PF: predicated region fallthrough
CT: control target
= control target key end

     0   :  { %14 = vsyncpa [#allocation3], 0  ;;  %s3140_s0 = inlined_call_operand.hbm [shape: f32[512,128], index: 0, kind: input, shape index: {}]   ;;  %s3141_s1 = inlined_call_operand.vmem [shape: f32[128,128], index: 1, kind: input, shape index: {}]   ;;  %s3142_s2 = inlined_call_operand.vmem [shape: f32[1,128], index: 2, kind: input, shape index: {}]   ;;  %s3143_s3 = inlined_call_operand.vmem [shape: f32[1,128], index: 3, kind: input, shape index: {}]   ;;  %s3144_s4 = inlined_call_operand.vmem [shape: f32[1,128], index: 4, kind: input, shape index: {}]   ;;  %s3145_s5 = inlined_call_operand.vmem [shape: f32[128,2], index: 5, kind: input, shape index: {}]   ;;  %s3146_s6 = inlined_call_operand.vmem [shape: f32[1,2], index: 6, kind: input, shape index: {}]   ;;  %s3147_s7 = inlined_call_operand.vmem [shape: f32[2,128], index: 7, kind: input, shape index: {}]   ;;  %s3148_s8 = inlined_call_operand.vmem [shape: f32[1,128], index: 8, kind: input, shape index: {}]   ;;  %s3149_s9 = inlined_call_operand.hbm [shape: f32[2,256,128], index: 9, kind: output, shape index: {}]  }
   0x1   :  { %15 = vsyncpa [#allocation4], 0  ;;  %s1780_s30 = smov [#allocation2]   ;;  %s1732_s13 = scalar_lea.hbm %s3140_s0, 8192 }
   0x2   :  { %s21_s10 = sshll.u32 %s1780_s30, 4  ;;  %p1733_p0 = scmp.ne.s32.totalorder %s3140_s0, %s1732_s13  ;;  %s22_s10 = int_to_ptr.vmem [resolvable:$true] %s21_s10 }
   0x3   :  { %p1736_p1 = scmp.lt.u32.totalorder %s1732_s13, %s3140_s0 }
   0x5   :  { %p1738_p2 = pnand %p1736_p1, %p1733_p0 }
   0x7   :  { %1741 = shalt.err (!%p1738_p2)
}
   0x8   :  { %s1742_s18 = scalar_lea.vmem %s22_s10, 8192  ;;  %p1747_p4 = scmp.lt.s32.totalorder %s22_s10, %s22_s10 }
   0x9   :  { %p1743_p3 = scmp.ne.s32.totalorder %s22_s10, %s1742_s18  ;;  %p1748_p5 = scmp.lt.s32.totalorder %s1742_s18, %s1742_s18 }
   0xb   :  { %p1749_p6 = por %p1748_p5, %p1747_p4 }
   0xd   :  { %p1750_p7 = pnand %p1749_p6, %p1743_p3 }
   0xf   :  { %1753 = shalt.err (!%p1750_p7)
}
  0x10   :  { %s1781_s19 = smov 128   ;;  %s1782_s20 = smov 8  }
  0x11   :  { %27 = dma.hbm_to_vmem [thread:$0]  %s3140_s0, 8192, %s22_s10, [#allocation3], %s1781_s19, %s1781_s19, %s1782_s20  }
  0x12   :  { %1776 = dma.done.wait [#allocation3], 8192  }
  0x13   :  { %1777 = vsyncadd [#allocation3], 4294959104  ;;  %v111_v0 = vld [vmem:[%s3141_s1] sm:$0xff]  ;;  %v112_v1 = vld [vmem:[%s3141_s1 + $0x8] sm:$0xff]  ;;  %vm1784_vm0 = vmmov 0   ;;  %vm1033_vm1 = vcmask 1041409  }
  0x14   :  { %v113_v2 = vld [vmem:[%s3141_s1 + $0x10] sm:$0xff]  ;;  %v1648_v3 = vpack.c.bf16 %v112_v1, %v111_v0  ;;  %v114_v4 = vld [vmem:[%s3141_s1 + $0x18] sm:$0xff]  ;;  %v115_v6 = vld [vmem:[%s3141_s1 + $0x20] sm:$0xff]  ;;  %vm1119_vm2 = vcmask 1041408   ;;  %vm1115_vm3 = vcmask 15360  }
  0x15   :  { %v1652_v5 = vpack.c.bf16 %v114_v4, %v113_v2  ;;  %v116_v7 = vld [vmem:[%s3141_s1 + $0x28] sm:$0xff]  ;;  %v47_v9 = vld [vmem:[#allocation2] sm:$0xff]  ;;  %v117_v10 = vld [vmem:[%s3141_s1 + $0x30] sm:$0xff] }
  0x16   :  { %1649 = vmatprep.subr.bf16.mxu0 %v1648_v3  ;;  %1704 = vmatprep.subr.bf16.mxu1 %v1648_v3  ;;  %v1656_v8 = vpack.c.bf16 %v116_v7, %v115_v6  ;;  %v118_v11 = vld [vmem:[%s3141_s1 + $0x38] sm:$0xff]  ;;  %v119_v13 = vld [vmem:[%s3141_s1 + $0x40] sm:$0xff]  ;;  %v120_v14 = vld [vmem:[%s3141_s1 + $0x48] sm:$0xff] }
  0x17   :  { %1651 = vmatpush3.bf16.msra.mxu0 %v1648_v3  ;;  %1712 = vmatpush3.bf16.msra.mxu1 %v1648_v3  ;;  %v1660_v12 = vpack.c.bf16 %v118_v11, %v117_v10  ;;  %v1664_v15 = vpack.c.bf16 %v120_v14, %v119_v13  ;;  %v121_v16 = vld [vmem:[%s3141_s1 + $0x50] sm:$0xff]  ;;  %v122_v17 = vld [vmem:[%s3141_s1 + $0x58] sm:$0xff]  ;;  %v123_v20 = vld [vmem:[%s3141_s1 + $0x60] sm:$0xff] }
  0x18   :  { %1653 = vmatprep.subr.bf16.mxu0 %v1652_v5  ;;  %1705 = vmatprep.subr.bf16.mxu1 %v1652_v5  ;;  %v81_v18 = vld [vmem:[#allocation2 + $0x110] sm:$0xff]  ;;  %v1668_v19 = vpack.c.bf16 %v122_v17, %v121_v16  ;;  %v124_v21 = vld [vmem:[%s3141_s1 + $0x68] sm:$0xff]  ;;  %v126_v24 = vld [vmem:[%s3141_s1 + $0x78] sm:$0xff] }
  0x19   :  { %1512 = vmatprep.mubr.f32.mxu0 %v47_v9  ;;  %1563 = vmatprep.mubr.f32.mxu1 %v81_v18  ;;  %v1672_v22 = vpack.c.bf16 %v124_v21, %v123_v20  ;;  %v125_v23 = vld [vmem:[%s3141_s1 + $0x70] sm:$0xff]  ;;  %v48_v26 = vld [vmem:[#allocation2 + $0x8] sm:$0xff]  ;;  %v82_v27 = vld [vmem:[#allocation2 + $0x118] sm:$0xff] }
  0x1a   :  { %v1676_v25 = vpack.c.bf16 %v126_v24, %v125_v23  ;;  %v49_v28 = vld [vmem:[#allocation2 + $0x10] sm:$0xff]  ;;  %v83_v29 = vld [vmem:[#allocation2 + $0x120] sm:$0xff]  ;;  %v50_v30 = vld [vmem:[#allocation2 + $0x18] sm:$0xff] }
  0x1b   :  { %1655 = vmatpush3.bf16.msra.mxu0 %v1652_v5  ;;  %1713 = vmatpush3.bf16.msra.mxu1 %v1652_v5  ;;  %v84_v31 = vld [vmem:[#allocation2 + $0x128] sm:$0xff]  ;;  %v51_v32 = vld [vmem:[#allocation2 + $0x20] sm:$0xff]  ;;  %v85_v33 = vld [vmem:[#allocation2 + $0x130] sm:$0xff] }
  0x1c   :  { %1657 = vmatprep.subr.bf16.mxu0 %v1656_v8  ;;  %1706 = vmatprep.subr.bf16.mxu1 %v1656_v8  ;;  %v52_v34 = vld [vmem:[#allocation2 + $0x28] sm:$0xff]  ;;  %v86_v35 = vld [vmem:[#allocation2 + $0x138] sm:$0xff]  ;;  %v53_v36 = vld [vmem:[#allocation2 + $0x30] sm:$0xff] }
  0x1d   :  { %v87_v37 = vld [vmem:[#allocation2 + $0x140] sm:$0xff]  ;;  %v54_v38 = vld [vmem:[#allocation2 + $0x38] sm:$0xff]  ;;  %v88_v39 = vld [vmem:[#allocation2 + $0x148] sm:$0xff] }
  0x1e   :  { %v55_v40 = vld [vmem:[#allocation2 + $0x40] sm:$0xff]  ;;  %v89_v41 = vld [vmem:[#allocation2 + $0x150] sm:$0xff]  ;;  %v56_v42 = vld [vmem:[#allocation2 + $0x48] sm:$0xff] }
  0x1f   :  { %1659 = vmatpush3.bf16.msra.mxu0 %v1656_v8  ;;  %1714 = vmatpush3.bf16.msra.mxu1 %v1656_v8  ;;  %v90_v43 = vld [vmem:[#allocation2 + $0x158] sm:$0xff]  ;;  %v57_v44 = vld [vmem:[#allocation2 + $0x50] sm:$0xff]  ;;  %v91_v45 = vld [vmem:[#allocation2 + $0x160] sm:$0xff] }
  0x20   :  { %1661 = vmatprep.subr.bf16.mxu0 %v1660_v12  ;;  %1707 = vmatprep.subr.bf16.mxu1 %v1660_v12  ;;  %v58_v46 = vld [vmem:[#allocation2 + $0x58] sm:$0xff]  ;;  %v92_v47 = vld [vmem:[#allocation2 + $0x168] sm:$0xff]  ;;  %v59_v48 = vld [vmem:[#allocation2 + $0x60] sm:$0xff] }
  0x21   :  { %v93_v49 = vld [vmem:[#allocation2 + $0x170] sm:$0xff]  ;;  %v60_v50 = vld [vmem:[#allocation2 + $0x68] sm:$0xff]  ;;  %v94_v51 = vld [vmem:[#allocation2 + $0x178] sm:$0xff] }
  0x22   :  { %v61_v52 = vld [vmem:[#allocation2 + $0x70] sm:$0xff]  ;;  %v95_v53 = vld [vmem:[#allocation2 + $0x180] sm:$0xff]  ;;  %v62_v54 = vld [vmem:[#allocation2 + $0x78] sm:$0xff] }
  0x23   :  { %1663 = vmatpush3.bf16.msra.mxu0 %v1660_v12  ;;  %1715 = vmatpush3.bf16.msra.mxu1 %v1660_v12  ;;  %v96_v55 = vld [vmem:[#allocation2 + $0x188] sm:$0xff]  ;;  %v63_v56 = vld [vmem:[#allocation2 + $0x80] sm:$0xff]  ;;  %v97_v57 = vld [vmem:[#allocation2 + $0x190] sm:$0xff] }
  0x24   :  { %1665 = vmatprep.subr.bf16.mxu0 %v1664_v15  ;;  %1708 = vmatprep.subr.bf16.mxu1 %v1664_v15  ;;  %v64_v58 = vld [vmem:[#allocation2 + $0x88] sm:$0xff]  ;;  %v98_v59 = vld [vmem:[#allocation2 + $0x198] sm:$0xff]  ;;  %v65_v60 = vld [vmem:[#allocation2 + $0x90] sm:$0xff] }
  0x25   :  { %v99_v61 = vld [vmem:[#allocation2 + $0x1a0] sm:$0xff]  ;;  %v66_v62 = vld [vmem:[#allocation2 + $0x98] sm:$0xff]  ;;  %v100_v63 = vld [vmem:[#allocation2 + $0x1a8] sm:$0xff] }
  0x26   :  { %v67_v0 = vld [vmem:[#allocation2 + $0xa0] sm:$0xff]  ;;  %v101_v1 = vld [vmem:[#allocation2 + $0x1b0] sm:$0xff]  ;;  %v68_v2 = vld [vmem:[#allocation2 + $0xa8] sm:$0xff] }
  0x27   :  { %1667 = vmatpush3.bf16.msra.mxu0 %v1664_v15  ;;  %1716 = vmatpush3.bf16.msra.mxu1 %v1664_v15  ;;  %v102_v3 = vld [vmem:[#allocation2 + $0x1b8] sm:$0xff]  ;;  %v69_v4 = vld [vmem:[#allocation2 + $0xb0] sm:$0xff]  ;;  %v103_v5 = vld [vmem:[#allocation2 + $0x1c0] sm:$0xff] }
  0x28   :  { %1669 = vmatprep.subr.bf16.mxu0 %v1668_v19  ;;  %1709 = vmatprep.subr.bf16.mxu1 %v1668_v19  ;;  %v70_v6 = vld [vmem:[#allocation2 + $0xb8] sm:$0xff]  ;;  %v104_v7 = vld [vmem:[#allocation2 + $0x1c8] sm:$0xff]  ;;  %v71_v8 = vld [vmem:[#allocation2 + $0xc0] sm:$0xff] }
  0x29   :  { %v105_v9 = vld [vmem:[#allocation2 + $0x1d0] sm:$0xff]  ;;  %v72_v10 = vld [vmem:[#allocation2 + $0xc8] sm:$0xff]  ;;  %v106_v11 = vld [vmem:[#allocation2 + $0x1d8] sm:$0xff] }
  0x2a   :  { %v73_v12 = vld [vmem:[#allocation2 + $0xd0] sm:$0xff]  ;;  %v107_v13 = vld [vmem:[#allocation2 + $0x1e0] sm:$0xff]  ;;  %v74_v14 = vld [vmem:[#allocation2 + $0xd8] sm:$0xff] }
  0x2b   :  { %1671 = vmatpush3.bf16.msra.mxu0 %v1668_v19  ;;  %1717 = vmatpush3.bf16.msra.mxu1 %v1668_v19  ;;  %v108_v15 = vld [vmem:[#allocation2 + $0x1e8] sm:$0xff]  ;;  %v75_v16 = vld [vmem:[#allocation2 + $0xe0] sm:$0xff]  ;;  %v109_v17 = vld [vmem:[#allocation2 + $0x1f0] sm:$0xff] }
  0x2c   :  { %1673 = vmatprep.subr.bf16.mxu0 %v1672_v22  ;;  %1710 = vmatprep.subr.bf16.mxu1 %v1672_v22  ;;  %v76_v18 = vld [vmem:[#allocation2 + $0xe8] sm:$0xff]  ;;  %v110_v19 = vld [vmem:[#allocation2 + $0x1f8] sm:$0xff]  ;;  %v77_v20 = vld [vmem:[#allocation2 + $0xf0] sm:$0xff] }
  0x2d   :  { %v78_v21 = vld [vmem:[#allocation2 + $0xf8] sm:$0xff]  ;;  %v80_v23 = vld [vmem:[#allocation2 + $0x108] sm:$0xff]  ;;  %v1904_v24 = vld [vmem:[%s3142_s2] ss:$0 sm:$0xff] }
  0x2f   :  { %1675 = vmatpush3.bf16.msra.mxu0 %v1672_v22  ;;  %1718 = vmatpush3.bf16.msra.mxu1 %v1672_v22  ;;  %v79_v22 = vld [vmem:[#allocation2 + $0x100] sm:$0xff] }
  0x30   :  { %1677 = vmatprep.subr.bf16.mxu0 %v1676_v25  ;;  %1711 = vmatprep.subr.bf16.mxu1 %v1676_v25 }
  0x33   :  { %1679 = vmatpush3.bf16.msra.mxu0 %v1676_v25  ;;  %1719 = vmatpush3.bf16.msra.mxu1 %v1676_v25 }
  0x36   :  { %1513 = vmatmul.mubr.f32.vlgmr.msra.gmra.mrb[0].mxu0 %v48_v26  ;;  %1564 = vmatmul.mubr.f32.vlgmr.msra.gmra.mrb[0].mxu1 %v82_v27 }
  0x37   :  { %1515 = vmatprep.mubr.f32.mxu0 %v49_v28  ;;  %1566 = vmatprep.mubr.f32.mxu1 %v83_v29 }
  0x3a   :  { %1516 = vmatmul.mubr.f32.gmra.mrb[2].mxu0 %v50_v30  ;;  %1567 = vmatmul.mubr.f32.gmra.mrb[2].mxu1 %v84_v31 }
  0x3b   :  { %1518 = vmatprep.mubr.f32.mxu0 %v51_v32  ;;  %1569 = vmatprep.mubr.f32.mxu1 %v85_v33 }
  0x3e   :  { %1519 = vmatmul.mubr.f32.gmra.mrb[4].mxu0 %v52_v34  ;;  %1570 = vmatmul.mubr.f32.gmra.mrb[4].mxu1 %v86_v35 }
  0x3f   :  { %1521 = vmatprep.mubr.f32.mxu0 %v53_v36  ;;  %1572 = vmatprep.mubr.f32.mxu1 %v87_v37 }
  0x42   :  { %1522 = vmatmul.mubr.f32.gmra.mrb[6].mxu0 %v54_v38  ;;  %1573 = vmatmul.mubr.f32.gmra.mrb[6].mxu1 %v88_v39 }
  0x43   :  { %1524 = vmatprep.mubr.f32.mxu0 %v55_v40  ;;  %1575 = vmatprep.mubr.f32.mxu1 %v89_v41 }
  0x46   :  { %1525 = vmatmul.mubr.f32.gmra.mrb[8].mxu0 %v56_v42  ;;  %1576 = vmatmul.mubr.f32.gmra.mrb[8].mxu1 %v90_v43 }
  0x47   :  { %1527 = vmatprep.mubr.f32.mxu0 %v57_v44  ;;  %1578 = vmatprep.mubr.f32.mxu1 %v91_v45 }
  0x4a   :  { %1528 = vmatmul.mubr.f32.gmra.mrb[10].mxu0 %v58_v46  ;;  %1579 = vmatmul.mubr.f32.gmra.mrb[10].mxu1 %v92_v47 }
  0x4b   :  { %1530 = vmatprep.mubr.f32.mxu0 %v59_v48  ;;  %1581 = vmatprep.mubr.f32.mxu1 %v93_v49 }
  0x4e   :  { %1531 = vmatmul.mubr.f32.gmra.mrb[12].mxu0 %v60_v50  ;;  %1582 = vmatmul.mubr.f32.gmra.mrb[12].mxu1 %v94_v51 }
  0x4f   :  { %1533 = vmatprep.mubr.f32.mxu0 %v61_v52  ;;  %1584 = vmatprep.mubr.f32.mxu1 %v95_v53 }
  0x52   :  { %1534 = vmatmul.mubr.f32.gmra.mrb[14].mxu0 %v62_v54  ;;  %1585 = vmatmul.mubr.f32.gmra.mrb[14].mxu1 %v96_v55 }
  0x53   :  { %1536 = vmatprep.mubr.f32.mxu0 %v63_v56  ;;  %1587 = vmatprep.mubr.f32.mxu1 %v97_v57 }
  0x56   :  { %1537 = vmatmul.mubr.f32.gmra.mrb[16].mxu0 %v64_v58  ;;  %1588 = vmatmul.mubr.f32.gmra.mrb[16].mxu1 %v98_v59 }
  0x57   :  { %1539 = vmatprep.mubr.f32.mxu0 %v65_v60  ;;  %1590 = vmatprep.mubr.f32.mxu1 %v99_v61 }
  0x5a   :  { %1540 = vmatmul.mubr.f32.gmra.mrb[18].mxu0 %v66_v62  ;;  %1591 = vmatmul.mubr.f32.gmra.mrb[18].mxu1 %v100_v63 }
  0x5b   :  { %1542 = vmatprep.mubr.f32.mxu0 %v67_v0  ;;  %1593 = vmatprep.mubr.f32.mxu1 %v101_v1 }
  0x5e   :  { %1543 = vmatmul.mubr.f32.gmra.mrb[20].mxu0 %v68_v2  ;;  %1594 = vmatmul.mubr.f32.gmra.mrb[20].mxu1 %v102_v3 }
  0x5f   :  { %1545 = vmatprep.mubr.f32.mxu0 %v69_v4  ;;  %1596 = vmatprep.mubr.f32.mxu1 %v103_v5 }
  0x62   :  { %1546 = vmatmul.mubr.f32.gmra.mrb[22].mxu0 %v70_v6  ;;  %1597 = vmatmul.mubr.f32.gmra.mrb[22].mxu1 %v104_v7 }
  0x63   :  { %1548 = vmatprep.mubr.f32.mxu0 %v71_v8  ;;  %1599 = vmatprep.mubr.f32.mxu1 %v105_v9 }
  0x66   :  { %1549 = vmatmul.mubr.f32.gmra.mrb[24].mxu0 %v72_v10  ;;  %1600 = vmatmul.mubr.f32.gmra.mrb[24].mxu1 %v106_v11 }
  0x67   :  { %1551 = vmatprep.mubr.f32.mxu0 %v73_v12  ;;  %1602 = vmatprep.mubr.f32.mxu1 %v107_v13 }
  0x6a   :  { %1552 = vmatmul.mubr.f32.gmra.mrb[26].mxu0 %v74_v14  ;;  %1603 = vmatmul.mubr.f32.gmra.mrb[26].mxu1 %v108_v15 }
  0x6b   :  { %1554 = vmatprep.mubr.f32.mxu0 %v75_v16  ;;  %1605 = vmatprep.mubr.f32.mxu1 %v109_v17 }
  0x6e   :  { %1555 = vmatmul.mubr.f32.gmra.mrb[28].mxu0 %v76_v18  ;;  %1606 = vmatmul.mubr.f32.gmra.mrb[28].mxu1 %v110_v19 }
  0x6f   :  { %1557 = vmatprep.mubr.f32.mxu0 %v77_v20 }
  0x72   :  { %1558 = vmatmul.mubr.f32.gmra.mrb[30].mxu0 %v78_v21 }
  0x73   :  { %1560 = vmatprep.mubr.f32.mxu0 %v79_v22 }
  0x76   :  { %1561 = vmatmul.mubr.f32.gmra.mrb[32].mxu0 %v80_v23 }
 0x109   :  { %v1514_v25 = vpop.f32.mrb[0].mxu0  ;;  %v1906_v26 = vpop.f32.mrb[0].mxu1 }
 0x10a   :  { %v200_v27 = vpop.f32.mrb[1].mxu0  ;;  %v1908_v28 = vpop.f32.mrb[1].mxu1  ;;  %v1911_v29 = vadd.f32 %v1514_v25, %v1904_v24 }
 0x10b   :  { %v1914_v30 = vadd.f32 %v1904_v24, %v200_v27 }
 0x10d   :  { %v1517_v31 = vpop.f32.mrb[2].mxu0  ;;  %v1916_v32 = vpop.f32.mrb[2].mxu1  ;;  %v519_v35 = vadd.f32 %v1911_v29, %v1914_v30 }
 0x10e   :  { %v210_v33 = vpop.f32.mrb[3].mxu0  ;;  %v1918_v34 = vpop.f32.mrb[3].mxu1  ;;  %v1926_v37 = vadd.f32 %v1517_v31, %v1904_v24 }
 0x10f   :  { %v1923_v36 = vadd.f32 %v1904_v24, %v210_v33 }
 0x111   :  { %v520_v38 = vadd.f32 %v519_v35, %v1923_v36  ;;  %v1520_v39 = vpop.f32.mrb[4].mxu0  ;;  %v1929_v40 = vpop.f32.mrb[4].mxu1 }
 0x112   :  { %v220_v41 = vpop.f32.mrb[5].mxu0  ;;  %v1931_v42 = vpop.f32.mrb[5].mxu1  ;;  %v1938_v45 = vadd.f32 %v1520_v39, %v1904_v24 }
 0x113   :  { %v521_v43 = vadd.f32 %v520_v38, %v1926_v37  ;;  %v1935_v44 = vadd.f32 %v1904_v24, %v220_v41 }
 0x115   :  { %v522_v46 = vadd.f32 %v521_v43, %v1935_v44  ;;  %v1523_v47 = vpop.f32.mrb[6].mxu0  ;;  %v1941_v48 = vpop.f32.mrb[6].mxu1 }
 0x116   :  { %v230_v49 = vpop.f32.mrb[7].mxu0  ;;  %v1943_v50 = vpop.f32.mrb[7].mxu1  ;;  %v1950_v53 = vadd.f32 %v1523_v47, %v1904_v24 }
 0x117   :  { %v1946_v51 = vadd.f32 %v1904_v24, %v230_v49  ;;  %v523_v52 = vadd.f32 %v522_v46, %v1938_v45 }
 0x119   :  { %v524_v54 = vadd.f32 %v523_v52, %v1946_v51  ;;  %v1526_v55 = vpop.f32.mrb[8].mxu0  ;;  %v1953_v56 = vpop.f32.mrb[8].mxu1 }
 0x11a   :  { %v240_v57 = vpop.f32.mrb[9].mxu0  ;;  %v1955_v58 = vpop.f32.mrb[9].mxu1  ;;  %v1962_v61 = vadd.f32 %v1526_v55, %v1904_v24 }
 0x11b   :  { %v1958_v59 = vadd.f32 %v1904_v24, %v240_v57  ;;  %v525_v60 = vadd.f32 %v524_v54, %v1950_v53 }
 0x11d   :  { %v526_v62 = vadd.f32 %v525_v60, %v1958_v59  ;;  %v1529_v63 = vpop.f32.mrb[10].mxu0  ;;  %v1965_v0 = vpop.f32.mrb[10].mxu1 }
 0x11e   :  { %v250_v1 = vpop.f32.mrb[11].mxu0  ;;  %v1967_v2 = vpop.f32.mrb[11].mxu1  ;;  %v1974_v5 = vadd.f32 %v1529_v63, %v1904_v24 }
 0x11f   :  { %v1970_v3 = vadd.f32 %v1904_v24, %v250_v1  ;;  %v527_v4 = vadd.f32 %v526_v62, %v1962_v61 }
 0x121   :  { %v528_v6 = vadd.f32 %v527_v4, %v1970_v3  ;;  %v1532_v7 = vpop.f32.mrb[12].mxu0  ;;  %v1977_v8 = vpop.f32.mrb[12].mxu1 }
 0x122   :  { %v260_v9 = vpop.f32.mrb[13].mxu0  ;;  %v1979_v10 = vpop.f32.mrb[13].mxu1  ;;  %v1986_v13 = vadd.f32 %v1532_v7, %v1904_v24 }
 0x123   :  { %v1982_v11 = vadd.f32 %v1904_v24, %v260_v9  ;;  %v529_v12 = vadd.f32 %v528_v6, %v1974_v5 }
 0x125   :  { %v530_v14 = vadd.f32 %v529_v12, %v1982_v11  ;;  %v1535_v15 = vpop.f32.mrb[14].mxu0  ;;  %v1989_v16 = vpop.f32.mrb[14].mxu1 }
 0x126   :  { %v270_v17 = vpop.f32.mrb[15].mxu0  ;;  %v1991_v18 = vpop.f32.mrb[15].mxu1  ;;  %v1998_v21 = vadd.f32 %v1535_v15, %v1904_v24 }
 0x127   :  { %v1994_v19 = vadd.f32 %v1904_v24, %v270_v17  ;;  %v531_v20 = vadd.f32 %v530_v14, %v1986_v13 }
 0x129   :  { %v532_v22 = vadd.f32 %v531_v20, %v1994_v19  ;;  %v1538_v23 = vpop.f32.mrb[16].mxu0  ;;  %v2001_v25 = vpop.f32.mrb[16].mxu1 }
 0x12a   :  { %v280_v27 = vpop.f32.mrb[17].mxu0  ;;  %v2003_v31 = vpop.f32.mrb[17].mxu1  ;;  %v2010_v38 = vadd.f32 %v1538_v23, %v1904_v24 }
 0x12b   :  { %v2006_v33 = vadd.f32 %v1904_v24, %v280_v27  ;;  %v533_v35 = vadd.f32 %v532_v22, %v1998_v21 }
 0x12d   :  { %v534_v39 = vadd.f32 %v533_v35, %v2006_v33  ;;  %v1541_v41 = vpop.f32.mrb[18].mxu0  ;;  %v2013_v43 = vpop.f32.mrb[18].mxu1 }
 0x12e   :  { %v290_v46 = vpop.f32.mrb[19].mxu0  ;;  %v2015_v47 = vpop.f32.mrb[19].mxu1  ;;  %v2022_v54 = vadd.f32 %v1541_v41, %v1904_v24 }
 0x12f   :  { %v2018_v49 = vadd.f32 %v1904_v24, %v290_v46  ;;  %v535_v52 = vadd.f32 %v534_v39, %v2010_v38 }
 0x130   :  { %3207 = vst [vmem:[#allocation9_spill] sm:$0xff] %v2022_v54 }
 0x131   :  { %3206 = vst [vmem:[#allocation8_spill] sm:$0xff] %v2018_v49  ;;  %v536_v55 = vadd.f32 %v535_v52, %v2018_v49  ;;  %v1544_v57 = vpop.f32.mrb[20].mxu0  ;;  %v2025_v60 = vpop.f32.mrb[20].mxu1 }
 0x132   :  { %v300_v62 = vpop.f32.mrb[21].mxu0  ;;  %v2027_v63 = vpop.f32.mrb[21].mxu1  ;;  %v2034_v6 = vadd.f32 %v1544_v57, %v1904_v24 }
 0x133   :  { %v2030_v1 = vadd.f32 %v1904_v24, %v300_v62  ;;  %v537_v4 = vadd.f32 %v536_v55, %v2022_v54 }
 0x134   :  { %3209 = vst [vmem:[#allocation11_spill] sm:$0xff] %v2034_v6 }
 0x135   :  { %3208 = vst [vmem:[#allocation10_spill] sm:$0xff] %v2030_v1  ;;  %v538_v7 = vadd.f32 %v537_v4, %v2030_v1  ;;  %v1547_v9 = vpop.f32.mrb[22].mxu0  ;;  %v2037_v12 = vpop.f32.mrb[22].mxu1 }
 0x136   :  { %v310_v14 = vpop.f32.mrb[23].mxu0  ;;  %v2039_v15 = vpop.f32.mrb[23].mxu1  ;;  %v2046_v22 = vadd.f32 %v1547_v9, %v1904_v24 }
 0x137   :  { %v2042_v17 = vadd.f32 %v1904_v24, %v310_v14  ;;  %v539_v20 = vadd.f32 %v538_v7, %v2034_v6 }
 0x138   :  { %3211 = vst [vmem:[#allocation13_spill] sm:$0xff] %v2046_v22 }
 0x139   :  { %3210 = vst [vmem:[#allocation12_spill] sm:$0xff] %v2042_v17  ;;  %v540_v23 = vadd.f32 %v539_v20, %v2042_v17  ;;  %v1550_v27 = vpop.f32.mrb[24].mxu0  ;;  %v2049_v35 = vpop.f32.mrb[24].mxu1 }
 0x13a   :  { %v320_v39 = vpop.f32.mrb[25].mxu0  ;;  %v2051_v41 = vpop.f32.mrb[25].mxu1  ;;  %v2058_v55 = vadd.f32 %v1550_v27, %v1904_v24 }
 0x13b   :  { %v2054_v46 = vadd.f32 %v1904_v24, %v320_v39  ;;  %v541_v52 = vadd.f32 %v540_v23, %v2046_v22 }
 0x13c   :  { %3213 = vst [vmem:[#allocation15_spill] sm:$0xff] %v2058_v55 }
 0x13d   :  { %3212 = vst [vmem:[#allocation14_spill] sm:$0xff] %v2054_v46  ;;  %v542_v57 = vadd.f32 %v541_v52, %v2054_v46  ;;  %v1553_v62 = vpop.f32.mrb[26].mxu0  ;;  %v2061_v4 = vpop.f32.mrb[26].mxu1 }
 0x13e   :  { %v330_v7 = vpop.f32.mrb[27].mxu0  ;;  %v2063_v9 = vpop.f32.mrb[27].mxu1  ;;  %v2070_v39 = vadd.f32 %v1553_v62, %v1904_v24 }
 0x13f   :  { %v2066_v14 = vadd.f32 %v1904_v24, %v330_v7  ;;  %v543_v20 = vadd.f32 %v542_v57, %v2058_v55 }
 0x141   :  { %3214 = vst [vmem:[#allocation16_spill] sm:$0xff] %v2066_v14  ;;  %v544_v23 = vadd.f32 %v543_v20, %v2066_v14  ;;  %v1556_v27 = vpop.f32.mrb[28].mxu0  ;;  %v2073_v22 = vpop.f32.mrb[28].mxu1 }
 0x142   :  { %v340_v52 = vpop.f32.mrb[29].mxu0  ;;  %v2075_v46 = vpop.f32.mrb[29].mxu1  ;;  %v2082_v7 = vadd.f32 %v1556_v27, %v1904_v24 }
 0x143   :  { %v2078_v17 = vadd.f32 %v1904_v24, %v340_v52  ;;  %v545_v6 = vadd.f32 %v544_v23, %v2070_v39 }
 0x145   :  { %v546_v57 = vadd.f32 %v545_v6, %v2078_v17  ;;  %v1559_v62 = vpop.f32.mrb[30].mxu0 }
 0x146   :  { %v350_v55 = vpop.f32.mrb[31].mxu0  ;;  %v2090_v1 = vadd.f32 %v1559_v62, %v1904_v24 }
 0x147   :  { %v2086_v20 = vadd.f32 %v1904_v24, %v350_v55  ;;  %v547_v14 = vadd.f32 %v546_v57, %v2082_v7  ;;  %v2103_v57 = vadd.f32 %v1904_v24, %v1908_v28 }
 0x149   :  { %v548_v52 = vadd.f32 %v547_v14, %v2086_v20  ;;  %v1562_v54 = vpop.f32.mrb[32].mxu0  ;;  %v2108_v14 = vadd.f32 %v1906_v26, %v1904_v24 }
 0x14a   :  { %v360_v49 = vpop.f32.mrb[33].mxu0  ;;  %v2098_v6 = vadd.f32 %v1562_v54, %v1904_v24 }
 0x14b   :  { %v2094_v23 = vadd.f32 %v1904_v24, %v360_v49  ;;  %v549_v27 = vadd.f32 %v548_v52, %v2090_v1  ;;  %v2113_v52 = vadd.f32 %v1904_v24, %v1918_v34 }
 0x14d   :  { %v550_v55 = vadd.f32 %v549_v27, %v2094_v23  ;;  %v2118_v27 = vadd.f32 %v1916_v32, %v1904_v24 }
 0x14f   :  { %v551_v62 = vadd.f32 %v550_v55, %v2098_v6  ;;  %v2123_v55 = vadd.f32 %v1904_v24, %v1931_v42 }
 0x151   :  { %v552_v49 = vadd.f32 %v551_v62, %v2103_v57  ;;  %3215 = vst [vmem:[#allocation17_spill] sm:$0xff] %v2123_v55  ;;  %v2128_v62 = vadd.f32 %v1929_v40, %v1904_v24 }
 0x153   :  { %v553_v54 = vadd.f32 %v552_v49, %v2108_v14  ;;  %3216 = vst [vmem:[#allocation18_spill] sm:$0xff] %v2128_v62  ;;  %v2133_v49 = vadd.f32 %v1904_v24, %v1943_v50 }
 0x155   :  { %v554_v28 = vadd.f32 %v553_v54, %v2113_v52  ;;  %3217 = vst [vmem:[#allocation19_spill] sm:$0xff] %v2133_v49  ;;  %v2138_v54 = vadd.f32 %v1941_v48, %v1904_v24 }
 0x157   :  { %v555_v26 = vadd.f32 %v554_v28, %v2118_v27  ;;  %3218 = vst [vmem:[#allocation20_spill] sm:$0xff] %v2138_v54  ;;  %v2143_v28 = vadd.f32 %v1904_v24, %v1955_v58 }
 0x159   :  { %v556_v34 = vadd.f32 %v555_v26, %v2123_v55  ;;  %3219 = vst [vmem:[#allocation21_spill] sm:$0xff] %v2143_v28  ;;  %v2148_v26 = vadd.f32 %v1953_v56, %v1904_v24  ;;  %v436_v56 = vadd.f32 %v1977_v8, %v1904_v24  ;;  %v461_v8 = vadd.f32 %v1904_v24, %v2015_v47 }
 0x15a   :  { %v486_v47 = vadd.f32 %v2037_v12, %v1904_v24  ;;  %v511_v12 = vadd.f32 %v1904_v24, %v2075_v46 }
 0x15b   :  { %v557_v32 = vadd.f32 %v556_v34, %v2128_v62  ;;  %3220 = vst [vmem:[#allocation22_spill] sm:$0xff] %v2148_v26  ;;  %v2153_v34 = vadd.f32 %v1904_v24, %v1967_v2 }
 0x15d   :  { %v558_v42 = vadd.f32 %v557_v32, %v2133_v49  ;;  %3221 = vst [vmem:[#allocation23_spill] sm:$0xff] %v2153_v34  ;;  %v426_v32 = vadd.f32 %v1965_v0, %v1904_v24  ;;  %v451_v0 = vadd.f32 %v1904_v24, %v2003_v31  ;;  %v476_v31 = vadd.f32 %v2025_v60, %v1904_v24 }
 0x15e   :  { %v501_v60 = vadd.f32 %v1904_v24, %v2063_v9 }
 0x15f   :  { %v559_v40 = vadd.f32 %v558_v42, %v2138_v54  ;;  %v431_v42 = vadd.f32 %v1904_v24, %v1979_v10  ;;  %v456_v10 = vadd.f32 %v2001_v25, %v1904_v24  ;;  %v481_v25 = vadd.f32 %v1904_v24, %v2039_v15 }
 0x160   :  { %v506_v15 = vadd.f32 %v2061_v4, %v1904_v24 }
 0x161   :  { %v560_v50 = vadd.f32 %v559_v40, %v2143_v28  ;;  %v441_v40 = vadd.f32 %v1904_v24, %v1991_v18  ;;  %v466_v18 = vadd.f32 %v2013_v43, %v1904_v24  ;;  %v491_v43 = vadd.f32 %v1904_v24, %v2051_v41 }
 0x162   :  { %v516_v41 = vadd.f32 %v2073_v22, %v1904_v24 }
 0x163   :  { %v561_v48 = vadd.f32 %v560_v50, %v2148_v26  ;;  %v446_v50 = vadd.f32 %v1989_v16, %v1904_v24  ;;  %v471_v16 = vadd.f32 %v1904_v24, %v2027_v63  ;;  %v496_v63 = vadd.f32 %v2049_v35, %v1904_v24 }
 0x165   :  { %v562_v58 = vadd.f32 %v561_v48, %v2153_v34 }
 0x167   :  { %v563_v54 = vadd.f32 %v562_v58, %v426_v32 }
 0x169   :  { %v564_v49 = vadd.f32 %v563_v54, %v431_v42 }
 0x16b   :  { %v565_v2 = vadd.f32 %v564_v49, %v436_v56 }
 0x16d   :  { %v566_v26 = vadd.f32 %v565_v2, %v441_v40 }
 0x16f   :  { %v567_v48 = vadd.f32 %v566_v26, %v446_v50 }
 0x171   :  { %v568_v58 = vadd.f32 %v567_v48, %v451_v0 }
 0x173   :  { %v569_v54 = vadd.f32 %v568_v58, %v456_v10 }
 0x175   :  { %v570_v49 = vadd.f32 %v569_v54, %v461_v8 }
 0x177   :  { %v571_v2 = vadd.f32 %v570_v49, %v466_v18 }
 0x179   :  { %v572_v26 = vadd.f32 %v571_v2, %v471_v16 }
 0x17b   :  { %v573_v48 = vadd.f32 %v572_v26, %v476_v31 }
 0x17d   :  { %v574_v58 = vadd.f32 %v573_v48, %v481_v25 }
 0x17f   :  { %v575_v54 = vadd.f32 %v574_v58, %v486_v47 }
 0x181   :  { %v576_v49 = vadd.f32 %v575_v54, %v491_v43 }
 0x183   :  { %v577_v2 = vadd.f32 %v576_v49, %v496_v63 }
 0x185   :  { %v578_v26 = vadd.f32 %v577_v2, %v501_v60 }
 0x187   :  { %v579_v48 = vadd.f32 %v578_v26, %v506_v15 }
 0x189   :  { %v580_v58 = vadd.f32 %v579_v48, %v511_v12 }
 0x18b   :  { %v581_v34 = vadd.f32 %v580_v58, %v516_v41 }
 0x18d   :  { %v582_v28 = vrot.slane %v581_v34, 4 }
 0x18f   :  { %v583_v35 = vadd.f32 %v582_v28, %v581_v34 }
 0x191   :  { %v584_v54 = vrot.slane %v583_v35, 2 }
 0x193   :  { %v585_v62 = vadd.f32 %v584_v54, %v583_v35 }
 0x195   :  { %v586_v55 = vrot.slane %v585_v62, 1 }
 0x197   :  { %v587_v9 = vadd.f32 %v586_v55, %v585_v62 }
 0x199   :  { %v2195_v49 = vmul.f32 0.001953125, %v587_v9 }
 0x19b   :  { %v2198_v4 = vsub.f32 %v426_v32, %v2195_v49  ;;  %v2201_v2 = vsub.f32 %v431_v42, %v2195_v49  ;;  %v2204_v46 = vsub.f32 %v436_v56, %v2195_v49  ;;  %v2207_v24 = vsub.f32 %v441_v40, %v2195_v49 }
 0x19c   :  { %v2210_v22 = vsub.f32 %v446_v50, %v2195_v49  ;;  %v2213_v28 = vsub.f32 %v451_v0, %v2195_v49  ;;  %v2216_v55 = vsub.f32 %v456_v10, %v2195_v49  ;;  %v2219_v62 = vsub.f32 %v461_v8, %v2195_v49 }
 0x19d   :  { %v2222_v34 = vsub.f32 %v466_v18, %v2195_v49  ;;  %v2225_v32 = vsub.f32 %v471_v16, %v2195_v49  ;;  %v2228_v42 = vsub.f32 %v476_v31, %v2195_v49  ;;  %v2231_v56 = vsub.f32 %v481_v25, %v2195_v49 }
 0x19e   :  { %v2234_v40 = vsub.f32 %v486_v47, %v2195_v49  ;;  %v2237_v50 = vsub.f32 %v491_v43, %v2195_v49  ;;  %v2240_v0 = vsub.f32 %v496_v63, %v2195_v49  ;;  %v2243_v10 = vsub.f32 %v501_v60, %v2195_v49 }
 0x19f   :  { %v2246_v8 = vsub.f32 %v506_v15, %v2195_v49  ;;  %v2249_v18 = vsub.f32 %v511_v12, %v2195_v49  ;;  %v2252_v16 = vsub.f32 %v516_v41, %v2195_v49  ;;  %v2256_v31 = vsub.f32 %v1914_v30, %v2195_v49 }
 0x1a0   :  { %v2260_v25 = vsub.f32 %v1911_v29, %v2195_v49  ;;  %v2264_v47 = vsub.f32 %v1923_v36, %v2195_v49  ;;  %v2272_v60 = vsub.f32 %v1926_v37, %v2195_v49  ;;  %v2276_v30 = vsub.f32 %v1935_v44, %v2195_v49 }
 0x1a1   :  { %3222 = vst [vmem:[#allocation24_spill] sm:$0xff] %v2252_v16  ;;  %v654_v43 = vmul.f32 %v2256_v31, %v2256_v31  ;;  %v2282_v36 = vsub.f32 %v1938_v45, %v2195_v49  ;;  %v2288_v37 = vsub.f32 %v1946_v51, %v2195_v49  ;;  %v2294_v41 = vsub.f32 %v1950_v53, %v2195_v49 }
 0x1a2   :  { %v655_v63 = vmul.f32 %v2260_v25, %v2260_v25  ;;  %v656_v29 = vmul.f32 %v2264_v47, %v2264_v47  ;;  %v657_v26 = vmul.f32 %v2272_v60, %v2272_v60  ;;  %v658_v44 = vmul.f32 %v2276_v30, %v2276_v30 }
 0x1a3   :  { %v659_v45 = vmul.f32 %v2282_v36, %v2282_v36  ;;  %v2300_v35 = vsub.f32 %v1958_v59, %v2195_v49  ;;  %v660_v51 = vmul.f32 %v2288_v37, %v2288_v37  ;;  %v2306_v9 = vsub.f32 %v1962_v61, %v2195_v49 }
 0x1a4   :  { %v718_v15 = vadd.f32 %v655_v63, %v654_v43  ;;  %v661_v53 = vmul.f32 %v2294_v41, %v2294_v41  ;;  %v2312_v63 = vsub.f32 %v1970_v3, %v2195_v49 }
 0x1a5   :  { %v662_v59 = vmul.f32 %v2300_v35, %v2300_v35  ;;  %v663_v61 = vmul.f32 %v2306_v9, %v2306_v9 }
 0x1a6   :  { %v719_v12 = vadd.f32 %v718_v15, %v656_v29  ;;  %v2318_v15 = vsub.f32 %v1974_v5, %v2195_v49  ;;  %v664_v3 = vmul.f32 %v2312_v63, %v2312_v63 }
 0x1a8   :  { %v720_v48 = vadd.f32 %v719_v12, %v657_v26  ;;  %v2324_v12 = vsub.f32 %v1982_v11, %v2195_v49  ;;  %v665_v5 = vmul.f32 %v2318_v15, %v2318_v15 }
 0x1aa   :  { %v721_v58 = vadd.f32 %v720_v48, %v658_v44  ;;  %v2330_v48 = vsub.f32 %v1986_v13, %v2195_v49  ;;  %v666_v11 = vmul.f32 %v2324_v12, %v2324_v12 }
 0x1ac   :  { %v722_v54 = vadd.f32 %v721_v58, %v659_v45  ;;  %v2336_v58 = vsub.f32 %v1994_v19, %v2195_v49  ;;  %v667_v13 = vmul.f32 %v2330_v48, %v2330_v48 }
 0x1ae   :  { %v723_v43 = vadd.f32 %v722_v54, %v660_v51  ;;  %v2342_v54 = vsub.f32 %v1998_v21, %v2195_v49  ;;  %v668_v19 = vmul.f32 %v2336_v58, %v2336_v58 }
 0x1b0   :  { %v724_v29 = vadd.f32 %v723_v43, %v661_v53  ;;  %v2348_v43 = vsub.f32 %v2006_v33, %v2195_v49  ;;  %v669_v21 = vmul.f32 %v2342_v54, %v2342_v54 }
 0x1b2   :  { %v725_v26 = vadd.f32 %v724_v29, %v662_v59  ;;  %v2354_v29 = vsub.f32 %v2010_v38, %v2195_v49  ;;  %v670_v33 = vmul.f32 %v2348_v43, %v2348_v43 }
 0x1b4   :  { %v726_v44 = vadd.f32 %v725_v26, %v663_v61  ;;  %3223 = vst [vmem:[#allocation25_spill] sm:$0xff] %v2354_v29  ;;  %v3224_v26 = vld [vmem:[#allocation8_spill] sm:$0xff]  ;;  %v671_v38 = vmul.f32 %v2354_v29, %v2354_v29 }
 0x1b6   :  { %v727_v45 = vadd.f32 %v726_v44, %v664_v3  ;;  %v2360_v3 = vsub.f32 %v3224_v26, %v2195_v49 }
 0x1b8   :  { %v728_v51 = vadd.f32 %v727_v45, %v665_v5  ;;  %3225 = vst [vmem:[#allocation8_spill] sm:$0xff] %v2360_v3  ;;  %v3226_v5 = vld [vmem:[#allocation9_spill] sm:$0xff] }
 0x1b9   :  { %v2366_v45 = vsub.f32 %v3226_v5, %v2195_v49  ;;  %v3232_v5 = vld [vmem:[#allocation12_spill] sm:$0xff] }
 0x1ba   :  { %v729_v53 = vadd.f32 %v728_v51, %v666_v11  ;;  %v3228_v51 = vld [vmem:[#allocation10_spill] sm:$0xff]  ;;  %v2384_v29 = vsub.f32 %v3232_v5, %v2195_v49  ;;  %v3238_v5 = vld [vmem:[#allocation15_spill] sm:$0xff] }
 0x1bb   :  { %3227 = vst [vmem:[#allocation9_spill] sm:$0xff] %v2366_v45 }
 0x1bc   :  { %v730_v59 = vadd.f32 %v729_v53, %v667_v13  ;;  %v2372_v13 = vsub.f32 %v3228_v51, %v2195_v49  ;;  %v672_v53 = vmul.f32 %v2360_v3, %v2360_v3  ;;  %3233 = vst [vmem:[#allocation12_spill] sm:$0xff] %v2384_v29  ;;  %v3234_v51 = vld [vmem:[#allocation13_spill] sm:$0xff] }
 0x1bd   :  { %v2390_v3 = vsub.f32 %v3234_v51, %v2195_v49  ;;  %v3240_v51 = vld [vmem:[#allocation16_spill] sm:$0xff] }
 0x1be   :  { %v731_v61 = vadd.f32 %v730_v59, %v668_v19  ;;  %3229 = vst [vmem:[#allocation10_spill] sm:$0xff] %v2372_v13  ;;  %v3230_v59 = vld [vmem:[#allocation11_spill] sm:$0xff] }
 0x1bf   :  { %v2378_v26 = vsub.f32 %v3230_v59, %v2195_v49  ;;  %3235 = vst [vmem:[#allocation13_spill] sm:$0xff] %v2390_v3  ;;  %v3236_v59 = vld [vmem:[#allocation14_spill] sm:$0xff] }
 0x1c0   :  { %v732_v44 = vadd.f32 %v731_v61, %v669_v21  ;;  %v673_v21 = vmul.f32 %v2366_v45, %v2366_v45  ;;  %v2396_v45 = vsub.f32 %v3236_v59, %v2195_v49  ;;  %v2414_v59 = vsub.f32 %v2070_v39, %v2195_v49 }
 0x1c1   :  { %3231 = vst [vmem:[#allocation11_spill] sm:$0xff] %v2378_v26 }
 0x1c2   :  { %v733_v11 = vadd.f32 %v732_v44, %v670_v33  ;;  %v674_v33 = vmul.f32 %v2372_v13, %v2372_v13  ;;  %3237 = vst [vmem:[#allocation14_spill] sm:$0xff] %v2396_v45  ;;  %v2402_v13 = vsub.f32 %v3238_v5, %v2195_v49  ;;  %3242 = vst [vmem:[#allocation26_spill] sm:$0xff] %v2414_v59 }
 0x1c3   :  { %v2420_v5 = vsub.f32 %v2078_v17, %v2195_v49  ;;  %v681_v39 = vmul.f32 %v2414_v59, %v2414_v59 }
 0x1c4   :  { %v734_v19 = vadd.f32 %v733_v11, %v671_v38  ;;  %v675_v38 = vmul.f32 %v2378_v26, %v2378_v26  ;;  %3239 = vst [vmem:[#allocation15_spill] sm:$0xff] %v2402_v13  ;;  %v2408_v26 = vsub.f32 %v3240_v51, %v2195_v49  ;;  %v2426_v51 = vsub.f32 %v2082_v7, %v2195_v49 }
 0x1c5   :  { %3243 = vst [vmem:[#allocation27_spill] sm:$0xff] %v2420_v5  ;;  %v682_v17 = vmul.f32 %v2420_v5, %v2420_v5 }
 0x1c6   :  { %v735_v61 = vadd.f32 %v734_v19, %v672_v53  ;;  %v676_v53 = vmul.f32 %v2384_v29, %v2384_v29  ;;  %3241 = vst [vmem:[#allocation16_spill] sm:$0xff] %v2408_v26  ;;  %3244 = vst [vmem:[#allocation28_spill] sm:$0xff] %v2426_v51  ;;  %v683_v7 = vmul.f32 %v2426_v51, %v2426_v51 }
 0x1c8   :  { %v736_v44 = vadd.f32 %v735_v61, %v673_v21  ;;  %v677_v21 = vmul.f32 %v2390_v3, %v2390_v3 }
 0x1ca   :  { %v737_v11 = vadd.f32 %v736_v44, %v674_v33  ;;  %v678_v33 = vmul.f32 %v2396_v45, %v2396_v45  ;;  %v699_v45 = vmul.f32 %v2198_v4, %v2198_v4 }
 0x1cc   :  { %v738_v19 = vadd.f32 %v737_v11, %v675_v38  ;;  %v679_v38 = vmul.f32 %v2402_v13, %v2402_v13 }
 0x1ce   :  { %v739_v61 = vadd.f32 %v738_v19, %v676_v53  ;;  %v680_v53 = vmul.f32 %v2408_v26, %v2408_v26 }
 0x1d0   :  { %v740_v44 = vadd.f32 %v739_v61, %v677_v21  ;;  %v2432_v61 = vsub.f32 %v2086_v20, %v2195_v49 }
 0x1d2   :  { %v741_v11 = vadd.f32 %v740_v44, %v678_v33  ;;  %3245 = vst [vmem:[#allocation29_spill] sm:$0xff] %v2432_v61  ;;  %v2438_v44 = vsub.f32 %v2090_v1, %v2195_v49  ;;  %v684_v20 = vmul.f32 %v2432_v61, %v2432_v61 }
 0x1d4   :  { %v742_v19 = vadd.f32 %v741_v11, %v679_v38  ;;  %3246 = vst [vmem:[#allocation30_spill] sm:$0xff] %v2438_v44  ;;  %v2444_v11 = vsub.f32 %v2094_v23, %v2195_v49  ;;  %v685_v1 = vmul.f32 %v2438_v44, %v2438_v44 }
 0x1d6   :  { %v743_v21 = vadd.f32 %v742_v19, %v680_v53  ;;  %v2450_v19 = vsub.f32 %v2098_v6, %v2195_v49  ;;  %v686_v23 = vmul.f32 %v2444_v11, %v2444_v11 }
 0x1d8   :  { %v744_v33 = vadd.f32 %v743_v21, %v681_v39  ;;  %v2456_v21 = vsub.f32 %v2103_v57, %v2195_v49  ;;  %v687_v6 = vmul.f32 %v2450_v19, %v2450_v19 }
 0x1da   :  { %v745_v38 = vadd.f32 %v744_v33, %v682_v17  ;;  %v2462_v33 = vsub.f32 %v2108_v14, %v2195_v49  ;;  %v688_v57 = vmul.f32 %v2456_v21, %v2456_v21 }
 0x1dc   :  { %v746_v53 = vadd.f32 %v745_v38, %v683_v7  ;;  %v2468_v38 = vsub.f32 %v2113_v52, %v2195_v49  ;;  %v689_v14 = vmul.f32 %v2462_v33, %v2462_v33 }
 0x1de   :  { %v747_v39 = vadd.f32 %v746_v53, %v684_v20  ;;  %v2474_v53 = vsub.f32 %v2118_v27, %v2195_v49  ;;  %v690_v52 = vmul.f32 %v2468_v38, %v2468_v38 }
 0x1e0   :  { %v748_v17 = vadd.f32 %v747_v39, %v685_v1  ;;  %v3247_v39 = vld [vmem:[#allocation17_spill] sm:$0xff]  ;;  %v691_v27 = vmul.f32 %v2474_v53, %v2474_v53 }
 0x1e1   :  { %v2480_v44 = vsub.f32 %v3247_v39, %v2195_v49  ;;  %v3250_v39 = vld [vmem:[#allocation20_spill] sm:$0xff] }
 0x1e2   :  { %v749_v7 = vadd.f32 %v748_v17, %v686_v23  ;;  %v3248_v17 = vld [vmem:[#allocation18_spill] sm:$0xff]  ;;  %v2498_v5 = vsub.f32 %v3250_v39, %v2195_v49  ;;  %v3253_v39 = vld [vmem:[#allocation23_spill] sm:$0xff] }
 0x1e3   :  { %v2486_v61 = vsub.f32 %v3248_v17, %v2195_v49  ;;  %v3251_v17 = vld [vmem:[#allocation21_spill] sm:$0xff]  ;;  %v2516_v13 = vsub.f32 %v3253_v39, %v2195_v49  ;;  %v701_v39 = vmul.f32 %v2204_v46, %v2204_v46 }
 0x1e4   :  { %v750_v20 = vadd.f32 %v749_v7, %v687_v6  ;;  %v3249_v7 = vld [vmem:[#allocation19_spill] sm:$0xff]  ;;  %v2504_v59 = vsub.f32 %v3251_v17, %v2195_v49 }
 0x1e5   :  { %v2492_v51 = vsub.f32 %v3249_v7, %v2195_v49  ;;  %v3252_v7 = vld [vmem:[#allocation22_spill] sm:$0xff] }
 0x1e6   :  { %v751_v1 = vadd.f32 %v750_v20, %v688_v57  ;;  %v692_v57 = vmul.f32 %v2480_v44, %v2480_v44  ;;  %v2510_v26 = vsub.f32 %v3252_v7, %v2195_v49  ;;  %v700_v49 = vmul.f32 %v2201_v2, %v2201_v2 }
 0x1e8   :  { %v752_v23 = vadd.f32 %v751_v1, %v689_v14  ;;  %v693_v14 = vmul.f32 %v2486_v61, %v2486_v61  ;;  %v697_v17 = vmul.f32 %v2510_v26, %v2510_v26 }
 0x1ea   :  { %v753_v6 = vadd.f32 %v752_v23, %v690_v52  ;;  %v694_v52 = vmul.f32 %v2492_v51, %v2492_v51 }
 0x1ec   :  { %v754_v20 = vadd.f32 %v753_v6, %v691_v27  ;;  %v695_v27 = vmul.f32 %v2498_v5, %v2498_v5 }
 0x1ee   :  { %v755_v1 = vadd.f32 %v754_v20, %v692_v57  ;;  %v696_v57 = vmul.f32 %v2504_v59, %v2504_v59 }
 0x1f0   :  { %v756_v23 = vadd.f32 %v755_v1, %v693_v14  ;;  %v698_v1 = vmul.f32 %v2516_v13, %v2516_v13 }
 0x1f2   :  { %v757_v6 = vadd.f32 %v756_v23, %v694_v52 }
 0x1f4   :  { %v758_v20 = vadd.f32 %v757_v6, %v695_v27  ;;  %v702_v6 = vmul.f32 %v2207_v24, %v2207_v24 }
 0x1f6   :  { %v759_v14 = vadd.f32 %v758_v20, %v696_v57  ;;  %v703_v20 = vmul.f32 %v2210_v22, %v2210_v22 }
 0x1f8   :  { %v760_v7 = vadd.f32 %v759_v14, %v697_v17  ;;  %v704_v14 = vmul.f32 %v2213_v28, %v2213_v28 }
 0x1fa   :  { %v761_v52 = vadd.f32 %v760_v7, %v698_v1  ;;  %v705_v7 = vmul.f32 %v2216_v55, %v2216_v55 }
 0x1fc   :  { %v762_v23 = vadd.f32 %v761_v52, %v699_v45  ;;  %v706_v52 = vmul.f32 %v2219_v62, %v2219_v62 }
 0x1fe   :  { %v763_v27 = vadd.f32 %v762_v23, %v700_v49  ;;  %v707_v23 = vmul.f32 %v2222_v34, %v2222_v34 }
 0x200   :  { %v764_v57 = vadd.f32 %v763_v27, %v701_v39  ;;  %v708_v27 = vmul.f32 %v2225_v32, %v2225_v32 }
 0x202   :  { %v765_v17 = vadd.f32 %v764_v57, %v702_v6  ;;  %v709_v57 = vmul.f32 %v2228_v42, %v2228_v42 }
 0x204   :  { %v766_v1 = vadd.f32 %v765_v17, %v703_v20  ;;  %v710_v17 = vmul.f32 %v2231_v56, %v2231_v56 }
 0x206   :  { %v767_v45 = vadd.f32 %v766_v1, %v704_v14  ;;  %v1008_v1 = vld [vmem:[%s3145_s5] sm:$0xff] }
 0x208   :  { %v768_v49 = vadd.f32 %v767_v45, %v705_v7  ;;  %v1009_v7 = vld [vmem:[%s3145_s5 + $0x8] sm:$0xff] }
 0x209   :  { %v1681_v45 = vpack.c.bf16 %v1009_v7, %v1008_v1  ;;  %v714_v1 = vmul.f32 %v2243_v10, %v2243_v10 }
 0x20a   :  { %v769_v39 = vadd.f32 %v768_v49, %v706_v52  ;;  %v711_v52 = vmul.f32 %v2234_v40, %v2234_v40 }
 0x20c   :  { %v770_v6 = vadd.f32 %v769_v39, %v707_v23  ;;  %v1783_v23 = vmov 0.0|0.0   ;;  %v712_v39 = vmul.f32 %v2237_v50, %v2237_v50 }
 0x20d   :  { %1680 = vmatprep.subr.bf16.mxu1 %v1783_v23 }
 0x20e   :  { %v771_v20 = vadd.f32 %v770_v6, %v708_v27  ;;  %1682 = vmatpush3.bf16.msra.mxu1 %v1681_v45  ;;  %v1010_v6 = vld [vmem:[%s3145_s5 + $0x10] sm:$0xff]  ;;  %v1012_v45 = vld [vmem:[%s3145_s5 + $0x20] sm:$0xff] }
 0x20f   :  { %1683 = vmatprep.subr.bf16.mxu1 %v1783_v23 }
 0x210   :  { %v772_v14 = vadd.f32 %v771_v20, %v709_v57  ;;  %v1011_v57 = vld [vmem:[%s3145_s5 + $0x18] sm:$0xff] }
 0x211   :  { %v1684_v20 = vpack.c.bf16 %v1011_v57, %v1010_v6  ;;  %v715_v6 = vmul.f32 %v2246_v8, %v2246_v8 }
 0x212   :  { %v773_v49 = vadd.f32 %v772_v14, %v710_v17  ;;  %v713_v17 = vmul.f32 %v2240_v0, %v2240_v0 }
 0x213   :  { %1685 = vmatpush3.bf16.msra.mxu1 %v1684_v20  ;;  %v1014_v20 = vld [vmem:[%s3145_s5 + $0x30] sm:$0xff] }
 0x214   :  { %v774_v27 = vadd.f32 %v773_v49, %v711_v52  ;;  %1686 = vmatprep.subr.bf16.mxu1 %v1783_v23  ;;  %v1013_v52 = vld [vmem:[%s3145_s5 + $0x28] sm:$0xff] }
 0x215   :  { %v1687_v49 = vpack.c.bf16 %v1013_v52, %v1012_v45  ;;  %v717_v45 = vmul.f32 %v2252_v16, %v2252_v16 }
 0x216   :  { %v775_v14 = vadd.f32 %v774_v27, %v712_v39  ;;  %v716_v39 = vmul.f32 %v2249_v18, %v2249_v18 }
 0x217   :  { %1688 = vmatpush3.bf16.msra.mxu1 %v1687_v49  ;;  %v1017_v49 = vld [vmem:[%s3145_s5 + $0x48] sm:$0xff] }
 0x218   :  { %v776_v7 = vadd.f32 %v775_v14, %v713_v17  ;;  %1689 = vmatprep.subr.bf16.mxu1 %v1783_v23  ;;  %v1015_v17 = vld [vmem:[%s3145_s5 + $0x38] sm:$0xff] }
 0x219   :  { %v1690_v14 = vpack.c.bf16 %v1015_v17, %v1014_v20  ;;  %v1020_v17 = vld [vmem:[%s3145_s5 + $0x60] sm:$0xff] }
 0x21a   :  { %v777_v57 = vadd.f32 %v776_v7, %v714_v1  ;;  %v1016_v7 = vld [vmem:[%s3145_s5 + $0x40] sm:$0xff] }
 0x21b   :  { %1691 = vmatpush3.bf16.msra.mxu1 %v1690_v14  ;;  %v1021_v14 = vld [vmem:[%s3145_s5 + $0x68] sm:$0xff] }
 0x21c   :  { %v778_v27 = vadd.f32 %v777_v57, %v715_v6  ;;  %1692 = vmatprep.subr.bf16.mxu1 %v1783_v23  ;;  %v1693_v6 = vpack.c.bf16 %v1017_v49, %v1016_v7  ;;  %v1022_v49 = vld [vmem:[%s3145_s5 + $0x70] sm:$0xff] }
 0x21e   :  { %v779_v52 = vadd.f32 %v778_v27, %v716_v39  ;;  %v1018_v39 = vld [vmem:[%s3145_s5 + $0x50] sm:$0xff]  ;;  %v1019_v27 = vld [vmem:[%s3145_s5 + $0x58] sm:$0xff] }
 0x21f   :  { %1694 = vmatpush3.bf16.msra.mxu1 %v1693_v6  ;;  %v1696_v20 = vpack.c.bf16 %v1019_v27, %v1018_v39  ;;  %v1023_v6 = vld [vmem:[%s3145_s5 + $0x78] sm:$0xff] }
 0x220   :  { %v780_v1 = vadd.f32 %v779_v52, %v717_v45  ;;  %1695 = vmatprep.subr.bf16.mxu1 %v1783_v23  ;;  %v3181_v52 = vmov 0.0   ;;  %v1702_v39 = vpack.c.bf16 %v1023_v6, %v1022_v49 }
 0x221   :  { %1640 = vmatprep.mubr.msk.f32.mxu1 %vm1784_vm0, %v3181_v52 }
 0x222   :  { %v781_v57 = vrot.slane %v780_v1, 4 }
 0x223   :  { %1697 = vmatpush3.bf16.msra.mxu1 %v1696_v20  ;;  %v3254_v20 = vmov 0.0  }
 0x224   :  { %v782_v3 = vadd.f32 %v781_v57, %v780_v1  ;;  %v1699_v1 = vpack.c.bf16 %v1021_v14, %v1020_v17  ;;  %1698 = vmatprep.subr.bf16.mxu1 %v1783_v23 }
 0x226   :  { %v783_v45 = vrot.slane %v782_v3, 2 }
 0x227   :  { %1700 = vmatpush3.bf16.msra.mxu1 %v1699_v1 }
 0x228   :  { %v784_v7 = vadd.f32 %v783_v45, %v782_v3  ;;  %1701 = vmatprep.subr.bf16.mxu1 %v1783_v23  ;;  %v792_v3 = vlaneseq  ;;  %v790_v45 = vld [vmem:[%s3143_s3] sm:$0x1] }
 0x22a   :  { %v785_v57 = vrot.slane %v784_v7, 1  ;;  %v2613_v17 = vshrl.u32 %v792_v3, 7 }
 0x22b   :  { %1703 = vmatpush3.bf16.msra.mxu1 %v1702_v39 }
 0x22c   :  { %v786_v27 = vadd.f32 %v785_v57, %v784_v7  ;;  %1643 = vmatprep.subr.mxu1 %v3254_v20  ;;  %v2619_v1 = vsub.s32 0, %v2613_v17  ;;  %v2631_v7 = vld [vmem:[%s3144_s4] ss:$0 sm:$0xff] }
 0x22e   :  { %v787_v16 = vmul.f32 0.001953125, %v786_v27 }
 0x230   :  { %v788_v52 = vadd.f32 1e-05, %v787_v16 }
 0x232   :  { %1728 = vrsqrt.f32 %v788_v52 }
 0x23c   :  { %v1729_v14 = vpop.eup %1728 }
 0x23d   :  { %v791_v29 = vmul.f32 %v1729_v14, %v790_v45 }
 0x23f   :  { %v2622_v23 = vrot.slane %v791_v29, %v2619_v1 }
 0x241   :  { %v828_v16 = vmul.f32 %v2622_v23, %v2444_v11  ;;  %v829_v52 = vmul.f32 %v2622_v23, %v2450_v19  ;;  %v830_v49 = vmul.f32 %v2622_v23, %v2456_v21  ;;  %v831_v11 = vmul.f32 %v2622_v23, %v2462_v33 }
 0x242   :  { %v832_v19 = vmul.f32 %v2622_v23, %v2468_v38  ;;  %v833_v21 = vmul.f32 %v2622_v23, %v2474_v53  ;;  %v834_v33 = vmul.f32 %v2622_v23, %v2480_v44  ;;  %v835_v45 = vmul.f32 %v2622_v23, %v2486_v61 }
 0x243   :  { %v2636_v6 = vadd.f32 %v2631_v7, %v828_v16  ;;  %v2639_v29 = vadd.f32 %v2631_v7, %v829_v52  ;;  %v2646_v57 = vadd.f32 %v2631_v7, %v830_v49  ;;  %v2653_v27 = vadd.f32 %v2631_v7, %v831_v11 }
 0x244   :  { %v2659_v14 = vadd.f32 %v2631_v7, %v832_v19  ;;  %v2665_v16 = vadd.f32 %v2631_v7, %v833_v21  ;;  %v836_v52 = vmul.f32 %v2622_v23, %v2492_v51  ;;  %v2671_v49 = vadd.f32 %v2631_v7, %v834_v33 }
 0x245   :  { %v968_v39 = vadd.f32 %v2639_v29, %v2636_v6  ;;  %v837_v11 = vmul.f32 %v2622_v23, %v2498_v5  ;;  %v2677_v19 = vadd.f32 %v2631_v7, %v835_v45  ;;  %v797_v21 = vmul.f32 %v2622_v23, %v2260_v25 }
 0x246   :  { %v838_v51 = vmul.f32 %v2622_v23, %v2504_v59  ;;  %v839_v5 = vmul.f32 %v2622_v23, %v2510_v26 }
 0x247   :  { %v969_v3 = vadd.f32 %v968_v39, %v2646_v57  ;;  %v796_v39 = vmul.f32 %v2622_v23, %v2256_v31  ;;  %v798_v31 = vmul.f32 %v2622_v23, %v2264_v47  ;;  %v2702_v59 = vadd.f32 %v2631_v7, %v797_v21 }
 0x248   :  { %v841_v47 = vmul.f32 %v2622_v23, %v2198_v4 }
 0x249   :  { %v970_v38 = vadd.f32 %v969_v3, %v2653_v27  ;;  %v2687_v3 = vadd.f32 %v2631_v7, %v836_v52  ;;  %v2699_v25 = vadd.f32 %v2631_v7, %v796_v39  ;;  %v2707_v52 = vadd.f32 %v2631_v7, %v838_v51 }
 0x24a   :  { %v800_v39 = vmul.f32 %v2622_v23, %v2276_v30 }
 0x24b   :  { %v971_v53 = vadd.f32 %v970_v38, %v2659_v14  ;;  %v2693_v38 = vadd.f32 %v2631_v7, %v837_v11  ;;  %3255 = vst [vmem:[#allocation17_spill] sm:$0xff] %v2707_v52  ;;  %v2715_v11 = vadd.f32 %v2631_v7, %v839_v5  ;;  %v931_v21 = vadd.f32 %v2702_v59, %v2699_v25 }
 0x24d   :  { %v972_v44 = vadd.f32 %v971_v53, %v2665_v16  ;;  %v840_v53 = vmul.f32 %v2622_v23, %v2516_v13  ;;  %3256 = vst [vmem:[#allocation18_spill] sm:$0xff] %v2715_v11  ;;  %v2721_v13 = vadd.f32 %v2631_v7, %v798_v31  ;;  %v2740_v31 = vadd.f32 %v2631_v7, %v841_v47 }
 0x24e   :  { %v803_v47 = vmul.f32 %v2622_v23, %v2294_v41 }
 0x24f   :  { %v973_v61 = vadd.f32 %v972_v44, %v2671_v49  ;;  %v799_v44 = vmul.f32 %v2622_v23, %v2272_v60  ;;  %v842_v60 = vmul.f32 %v2622_v23, %v2201_v2  ;;  %v2728_v51 = vadd.f32 %v2631_v7, %v840_v53  ;;  %3258 = vst [vmem:[#allocation20_spill] sm:$0xff] %v2740_v31 }
 0x250   :  { %v932_v30 = vadd.f32 %v931_v21, %v2721_v13  ;;  %v802_v53 = vmul.f32 %v2622_v23, %v2288_v37 }
 0x251   :  { %v974_v33 = vadd.f32 %v973_v61, %v2677_v19  ;;  %3257 = vst [vmem:[#allocation19_spill] sm:$0xff] %v2728_v51  ;;  %v2734_v5 = vadd.f32 %v2631_v7, %v799_v44  ;;  %v844_v44 = vmul.f32 %v2622_v23, %v2207_v24 }
 0x253   :  { %v975_v45 = vadd.f32 %v974_v33, %v2687_v3  ;;  %v801_v33 = vmul.f32 %v2622_v23, %v2282_v36  ;;  %v933_v36 = vadd.f32 %v932_v30, %v2734_v5  ;;  %v2770_v30 = vadd.f32 %v2631_v7, %v802_v53 }
 0x254   :  { %v847_v53 = vmul.f32 %v2622_v23, %v2216_v55 }
 0x255   :  { %v976_v26 = vadd.f32 %v975_v45, %v2693_v38  ;;  %v843_v45 = vmul.f32 %v2622_v23, %v2204_v46  ;;  %v2758_v21 = vadd.f32 %v2631_v7, %v801_v33  ;;  %v846_v33 = vmul.f32 %v2622_v23, %v2213_v28 }
 0x257   :  { %v977_v61 = vadd.f32 %v976_v26, %v2707_v52  ;;  %v2746_v26 = vadd.f32 %v2631_v7, %v800_v39  ;;  %v845_v39 = vmul.f32 %v2622_v23, %v2210_v22 }
 0x259   :  { %v978_v4 = vadd.f32 %v977_v61, %v2715_v11  ;;  %v2752_v61 = vadd.f32 %v2631_v7, %v842_v60  ;;  %v934_v37 = vadd.f32 %v933_v36, %v2746_v26  ;;  %v804_v60 = vmul.f32 %v2622_v23, %v2300_v35 }
 0x25a   :  { %v2782_v36 = vadd.f32 %v2631_v7, %v803_v47  ;;  %v848_v47 = vmul.f32 %v2622_v23, %v2219_v62 }
 0x25b   :  { %v979_v2 = vadd.f32 %v978_v4, %v2728_v51  ;;  %3259 = vst [vmem:[#allocation21_spill] sm:$0xff] %v2752_v61  ;;  %v2764_v4 = vadd.f32 %v2631_v7, %v843_v45  ;;  %v935_v41 = vadd.f32 %v934_v37, %v2758_v21  ;;  %v805_v45 = vmul.f32 %v2622_v23, %v2306_v9 }
 0x25c   :  { %v2794_v37 = vadd.f32 %v2631_v7, %v804_v60  ;;  %v849_v60 = vmul.f32 %v2622_v23, %v2222_v34 }
 0x25d   :  { %v980_v46 = vadd.f32 %v979_v2, %v2740_v31  ;;  %3260 = vst [vmem:[#allocation22_spill] sm:$0xff] %v2764_v4  ;;  %v2776_v2 = vadd.f32 %v2631_v7, %v844_v44  ;;  %v936_v35 = vadd.f32 %v935_v41, %v2770_v30  ;;  %v806_v44 = vmul.f32 %v2622_v23, %v2312_v63 }
 0x25e   :  { %v2806_v41 = vadd.f32 %v2631_v7, %v805_v45  ;;  %v850_v45 = vmul.f32 %v2622_v23, %v2225_v32 }
 0x25f   :  { %v981_v24 = vadd.f32 %v980_v46, %v2752_v61  ;;  %3261 = vst [vmem:[#allocation23_spill] sm:$0xff] %v2776_v2  ;;  %v2788_v46 = vadd.f32 %v2631_v7, %v845_v39  ;;  %v937_v9 = vadd.f32 %v936_v35, %v2782_v36  ;;  %v807_v39 = vmul.f32 %v2622_v23, %v2318_v15 }
 0x260   :  { %v2818_v35 = vadd.f32 %v2631_v7, %v806_v44  ;;  %v851_v44 = vmul.f32 %v2622_v23, %v2228_v42 }
 0x261   :  { %v982_v22 = vadd.f32 %v981_v24, %v2764_v4  ;;  %3262 = vst [vmem:[#allocation31_spill] sm:$0xff] %v2788_v46  ;;  %v2800_v24 = vadd.f32 %v2631_v7, %v846_v33  ;;  %v938_v63 = vadd.f32 %v937_v9, %v2794_v37  ;;  %v808_v33 = vmul.f32 %v2622_v23, %v2324_v12 }
 0x262   :  { %v2830_v9 = vadd.f32 %v2631_v7, %v807_v39  ;;  %v852_v39 = vmul.f32 %v2622_v23, %v2231_v56 }
 0x263   :  { %v983_v28 = vadd.f32 %v982_v22, %v2776_v2  ;;  %3263 = vst [vmem:[#allocation32_spill] sm:$0xff] %v2800_v24  ;;  %v2812_v22 = vadd.f32 %v2631_v7, %v847_v53  ;;  %v939_v15 = vadd.f32 %v938_v63, %v2806_v41  ;;  %v809_v53 = vmul.f32 %v2622_v23, %v2330_v48 }
 0x264   :  { %v2842_v63 = vadd.f32 %v2631_v7, %v808_v33  ;;  %v853_v33 = vmul.f32 %v2622_v23, %v2234_v40 }
 0x265   :  { %v984_v55 = vadd.f32 %v983_v28, %v2788_v46  ;;  %3264 = vst [vmem:[#allocation33_spill] sm:$0xff] %v2812_v22  ;;  %v2824_v28 = vadd.f32 %v2631_v7, %v848_v47  ;;  %v940_v12 = vadd.f32 %v939_v15, %v2818_v35  ;;  %v810_v47 = vmul.f32 %v2622_v23, %v2336_v58  ;;  %v3291_v46 = vld [vmem:[#allocation29_spill] sm:$0xff] }
 0x266   :  { %v2854_v15 = vadd.f32 %v2631_v7, %v809_v53  ;;  %v854_v53 = vmul.f32 %v2622_v23, %v2237_v50 }
 0x267   :  { %v985_v62 = vadd.f32 %v984_v55, %v2800_v24  ;;  %3265 = vst [vmem:[#allocation34_spill] sm:$0xff] %v2824_v28  ;;  %v2836_v55 = vadd.f32 %v2631_v7, %v849_v60  ;;  %v941_v48 = vadd.f32 %v940_v12, %v2830_v9  ;;  %v811_v60 = vmul.f32 %v2622_v23, %v2342_v54 }
 0x268   :  { %v2866_v12 = vadd.f32 %v2631_v7, %v810_v47  ;;  %v855_v47 = vmul.f32 %v2622_v23, %v2240_v0 }
 0x269   :  { %v986_v34 = vadd.f32 %v985_v62, %v2812_v22  ;;  %3266 = vst [vmem:[#allocation35_spill] sm:$0xff] %v2836_v55  ;;  %v2848_v62 = vadd.f32 %v2631_v7, %v850_v45  ;;  %v942_v58 = vadd.f32 %v941_v48, %v2842_v63  ;;  %v812_v45 = vmul.f32 %v2622_v23, %v2348_v43 }
 0x26b   :  { %v987_v32 = vadd.f32 %v986_v34, %v2824_v28  ;;  %3267 = vst [vmem:[#allocation36_spill] sm:$0xff] %v2848_v62  ;;  %v2860_v34 = vadd.f32 %v2631_v7, %v851_v44  ;;  %v943_v54 = vadd.f32 %v942_v58, %v2854_v15  ;;  %v3270_v44 = vld [vmem:[#allocation25_spill] sm:$0xff]  ;;  %v2884_v58 = vadd.f32 %v2631_v7, %v853_v33 }
 0x26c   :  { %v813_v48 = vmul.f32 %v2622_v23, %v3270_v44  ;;  %v3274_v33 = vld [vmem:[#allocation9_spill] sm:$0xff] }
 0x26d   :  { %v988_v42 = vadd.f32 %v987_v32, %v2836_v55  ;;  %3268 = vst [vmem:[#allocation37_spill] sm:$0xff] %v2860_v34  ;;  %v2872_v32 = vadd.f32 %v2631_v7, %v852_v39  ;;  %v944_v43 = vadd.f32 %v943_v54, %v2866_v12  ;;  %3271 = vst [vmem:[#allocation25_spill] sm:$0xff] %v2884_v58  ;;  %v3272_v39 = vld [vmem:[#allocation8_spill] sm:$0xff] }
 0x26e   :  { %v2896_v54 = vadd.f32 %v2631_v7, %v854_v53  ;;  %v3276_v53 = vld [vmem:[#allocation10_spill] sm:$0xff] }
 0x26f   :  { %v989_v56 = vadd.f32 %v988_v42, %v2848_v62  ;;  %3269 = vst [vmem:[#allocation38_spill] sm:$0xff] %v2872_v32  ;;  %v2878_v42 = vadd.f32 %v2631_v7, %v811_v60  ;;  %v814_v62 = vmul.f32 %v2622_v23, %v3272_v39  ;;  %v856_v60 = vmul.f32 %v2622_v23, %v2243_v10 }
 0x270   :  { %3273 = vst [vmem:[#allocation8_spill] sm:$0xff] %v2896_v54 }
 0x271   :  { %v990_v40 = vadd.f32 %v989_v56, %v2860_v34  ;;  %v2890_v56 = vadd.f32 %v2631_v7, %v812_v45  ;;  %v945_v44 = vadd.f32 %v944_v43, %v2878_v42  ;;  %v815_v34 = vmul.f32 %v2622_v23, %v3274_v33 }
 0x272   :  { %v857_v45 = vmul.f32 %v2622_v23, %v2246_v8  ;;  %v2908_v43 = vadd.f32 %v2631_v7, %v855_v47  ;;  %v3278_v47 = vld [vmem:[#allocation11_spill] sm:$0xff] }
 0x273   :  { %v991_v50 = vadd.f32 %v990_v40, %v2872_v32  ;;  %v2902_v40 = vadd.f32 %v2631_v7, %v813_v48  ;;  %v946_v39 = vadd.f32 %v945_v44, %v2890_v56  ;;  %v816_v32 = vmul.f32 %v2622_v23, %v3276_v53 }
 0x274   :  { %3275 = vst [vmem:[#allocation9_spill] sm:$0xff] %v2908_v43  ;;  %v858_v48 = vmul.f32 %v2622_v23, %v2249_v18  ;;  %v2920_v44 = vadd.f32 %v2631_v7, %v856_v60 }
 0x275   :  { %v992_v0 = vadd.f32 %v991_v50, %v2884_v58  ;;  %v2914_v50 = vadd.f32 %v2631_v7, %v814_v62  ;;  %v947_v33 = vadd.f32 %v946_v39, %v2902_v40  ;;  %v817_v58 = vmul.f32 %v2622_v23, %v3278_v47 }
 0x276   :  { %3277 = vst [vmem:[#allocation10_spill] sm:$0xff] %v2920_v44  ;;  %v2930_v62 = vadd.f32 %v2631_v7, %v857_v45  ;;  %v2936_v60 = vadd.f32 %v2631_v7, %v816_v32  ;;  %v3283_v45 = vld [vmem:[#allocation13_spill] sm:$0xff] }
 0x277   :  { %v993_v10 = vadd.f32 %v992_v0, %v2896_v54  ;;  %v2926_v0 = vadd.f32 %v2631_v7, %v815_v34  ;;  %v948_v53 = vadd.f32 %v947_v33, %v2914_v50  ;;  %v3280_v54 = vld [vmem:[#allocation12_spill] sm:$0xff]  ;;  %v2942_v34 = vadd.f32 %v2631_v7, %v858_v48 }
 0x278   :  { %3279 = vst [vmem:[#allocation11_spill] sm:$0xff] %v2930_v62  ;;  %v818_v18 = vmul.f32 %v2622_v23, %v3280_v54  ;;  %v819_v55 = vmul.f32 %v2622_v23, %v3283_v45 }
 0x279   :  { %v994_v8 = vadd.f32 %v993_v10, %v2908_v43  ;;  %v949_v10 = vadd.f32 %v948_v53, %v2926_v0  ;;  %v3281_v43 = vld [vmem:[#allocation24_spill] sm:$0xff]  ;;  %3282 = vst [vmem:[#allocation12_spill] sm:$0xff] %v2942_v34 }
 0x27a   :  { %v859_v47 = vmul.f32 %v2622_v23, %v3281_v43  ;;  %v2955_v43 = vadd.f32 %v2631_v7, %v818_v18 }
 0x27b   :  { %v995_v39 = vadd.f32 %v994_v8, %v2920_v44  ;;  %v2948_v8 = vadd.f32 %v2631_v7, %v817_v58  ;;  %v950_v54 = vadd.f32 %v949_v10, %v2936_v60  ;;  %v3284_v44 = vld [vmem:[#allocation14_spill] sm:$0xff]  ;;  %v2964_v58 = vadd.f32 %v2631_v7, %v819_v55 }
 0x27c   :  { %v820_v53 = vmul.f32 %v2622_v23, %v3284_v44 }
 0x27d   :  { %v996_v33 = vadd.f32 %v995_v39, %v2930_v62  ;;  %v951_v48 = vadd.f32 %v950_v54, %v2948_v8  ;;  %v2959_v39 = vadd.f32 %v2631_v7, %v859_v47  ;;  %v3286_v62 = vld [vmem:[#allocation15_spill] sm:$0xff]  ;;  %v3288_v47 = vld [vmem:[#allocation26_spill] sm:$0xff] }
 0x27e   :  { %v821_v45 = vmul.f32 %v2622_v23, %v3286_v62  ;;  %v2971_v18 = vadd.f32 %v2631_v7, %v820_v53  ;;  %v823_v28 = vmul.f32 %v2622_v23, %v3288_v47  ;;  %v3290_v53 = vld [vmem:[#allocation28_spill] sm:$0xff] }
 0x27f   :  { %v997_v32 = vadd.f32 %v996_v33, %v2942_v34  ;;  %3285 = vst [vmem:[#allocation24_spill] sm:$0xff] %v2959_v39  ;;  %v952_v10 = vadd.f32 %v951_v48, %v2955_v43  ;;  %v3287_v34 = vld [vmem:[#allocation16_spill] sm:$0xff]  ;;  %v3289_v48 = vld [vmem:[#allocation27_spill] sm:$0xff] }
 0x280   :  { %v822_v44 = vmul.f32 %v2622_v23, %v3287_v34  ;;  %v2977_v62 = vadd.f32 %v2631_v7, %v821_v45  ;;  %v2989_v24 = vadd.f32 %v2631_v7, %v823_v28 }
 0x281   :  { %v998_v33 = vadd.f32 %v997_v32, %v2959_v39  ;;  %v953_v54 = vadd.f32 %v952_v10, %v2964_v58  ;;  %v824_v32 = vmul.f32 %v2622_v23, %v3289_v48  ;;  %v825_v10 = vmul.f32 %v2622_v23, %v3290_v53  ;;  %v3292_v48 = vld [vmem:[#allocation30_spill] sm:$0xff] }
 0x282   :  { %v2983_v39 = vadd.f32 %v2631_v7, %v822_v44 }
 0x283   :  { %v954_v55 = vadd.f32 %v953_v54, %v2971_v18  ;;  %v999_v22 = vrot.slane %v998_v33, 4  ;;  %v826_v54 = vmul.f32 %v2622_v23, %v3291_v46  ;;  %v2995_v2 = vadd.f32 %v2631_v7, %v824_v32 }
 0x284   :  { %v3001_v4 = vadd.f32 %v2631_v7, %v825_v10 }
 0x285   :  { %v955_v34 = vadd.f32 %v954_v55, %v2977_v62  ;;  %v1000_v47 = vadd.f32 %v999_v22, %v998_v33  ;;  %v827_v55 = vmul.f32 %v2622_v23, %v3292_v48 }
 0x287   :  { %v956_v45 = vadd.f32 %v955_v34, %v2983_v39  ;;  %v1001_v53 = vrot.slane %v1000_v47, 2  ;;  %v3005_v34 = vadd.f32 %v2631_v7, %v826_v54  ;;  %v3009_v46 = vadd.f32 %v2631_v7, %v827_v55  ;;  %v1107_v7 = vld [vmem:[%s3147_s7] sm:$0x3] }
 0x289   :  { %v957_v44 = vadd.f32 %v956_v45, %v2989_v24  ;;  %v1002_v45 = vadd.f32 %v1001_v53, %v1000_v47 }
 0x28b   :  { %v958_v28 = vadd.f32 %v957_v44, %v2995_v2  ;;  %v1003_v10 = vrot.slane %v1002_v45, 1 }
 0x28d   :  { %v959_v22 = vadd.f32 %v958_v28, %v3001_v4  ;;  %v1004_v44 = vadd.f32 %v1003_v10, %v1002_v45 }
 0x28f   :  { %v960_v33 = vadd.f32 %v959_v22, %v3005_v34  ;;  %v1007_v54 = vmul.f32 0.00390625, %v1004_v44 }
 0x291   :  { %v961_v32 = vadd.f32 %v960_v33, %v3009_v46  ;;  %v1786_v33 = vmov 1966171168  }
 0x293   :  { %v962_v23 = vrot.slane %v961_v32, 4 }
 0x295   :  { %v963_v48 = vadd.f32 %v962_v23, %v961_v32  ;;  %v1199_v32 = vunpack.c.l.s4 %v1786_v33 }
 0x297   :  { %v964_v61 = vrot.slane %v963_v48, 2  ;;  %v1200_v45 = vunpack.c.0.s8 %v1199_v32 }
 0x299   :  { %v965_v31 = vadd.f32 %v964_v61, %v963_v48  ;;  %v1377_v61 = vld [vmem:[%s3146_s6] ss:$0 sm:$0xff]  ;;  %v1203_v10 = vsub.s32 %v1200_v45, %v2613_v17  ;;  %s1787_s6 = smov [#allocation5]  }
 0x29a   :  { %s1363_s7 = sshll.u32 %s1787_s6, 4  ;;  %s1364_s7 = int_to_ptr.vmem [resolvable:$true] %s1363_s7 }
 0x29b   :  { %v966_v51 = vrot.slane %v965_v31, 1  ;;  %p1759_p9 = scmp.lt.s32.totalorder %s1364_s7, %s1364_s7 }
 0x29d   :  { %v967_v11 = vadd.f32 %v966_v51, %v965_v31 }
 0x29f   :  { %v1006_v52 = vmul.f32 0.00390625, %v967_v11 }
 0x2a1   :  { %v1034_v28 = vsel %vm1033_vm1, %v1007_v54, %v1006_v52 }
 0x2a2   :  { %1641 = vmatmul.mubr.f32.vlgmr.msra.gmra.mrb[30].mxu1 %v1034_v28 }
 0x2a3   :  { %1645 = vmatprep.mubr.msk.f32.mxu1 %vm1784_vm0, %v3254_v20  ;;  %1644 = vmatpush3.msk.msra.mxu1 %vm1119_vm2, %v1107_v7  ;;  %v1378_v20 = vld [vmem:[%s3148_s8] ss:$0 sm:$0xff]  ;;  %s1754_s8 = scalar_lea.vmem %s1364_s7, 8192 }
 0x2a4   :  { %p1755_p8 = scmp.ne.s32.totalorder %s1364_s7, %s1754_s8  ;;  %p1760_p10 = scmp.lt.s32.totalorder %s1754_s8, %s1754_s8 }
 0x2a6   :  { %p1761_p11 = por %p1760_p10, %p1759_p9 }
 0x2a8   :  { %p1762_p12 = pnand %p1761_p11, %p1755_p8 }
 0x375   :  { %v1102_v47 = vpop.f32.mrb[30].mxu1 }
 0x376   :  { %v1103_v51 = vadd.f32 %v1377_v61, %v1102_v47  ;;  %v1642_v31 = vpop.f32.mrb[31].mxu1 }
 0x378   :  { %v1106_v11 = vmax.f32 %v1103_v51, 0.0 }
 0x37a   :  { %1646 = vmatmul.mubr.msk.f32.vlgmr.msra.gmra.mrb[32].mxu1 %vm1115_vm3, %v1106_v11 }
 0x44d   :  { %v1189_v52 = vpop.f32.mrb[32].mxu1 }
 0x44e   :  { %v1190_v55 = vadd.f32 %v1378_v20, %v1189_v52  ;;  %v1647_v53 = vpop.f32.mrb[33].mxu1 }
 0x450   :  { %v1193_v22 = vmul.f32 0.5, %v1190_v55 }
 0x452   :  { %1730 = vtanh.f32 %v1193_v22 }
 0x45c   :  { %v1731_v23 = vpop.eup %1730 }
 0x45d   :  { %v1195_v48 = vadd.f32 1.0, %v1731_v23  ;;  %v3299_v23 = vld [vmem:[#allocation23_spill] sm:$0xff] }
 0x45f   :  { %v1196_v44 = vmul.f32 0.5, %v1195_v48 }
 0x461   :  { %v1204_v54 = vrot.slane %v1196_v44, %v1203_v10 }
 0x463   :  { %v1205_v28 = vcombine.high %v1204_v54, %v1204_v54  ;;  %v1212_v7 = vrot.slane %v1204_v54, %v1203_v10  ;;  %v3301_v54 = vld [vmem:[#allocation32_spill] sm:$0xff] }
 0x465   :  { %v1219_v61 = vrot.slane %v1205_v28, %v1203_v10  ;;  %v1223_v47 = vrot.slane %v1212_v7, %v2619_v1  ;;  %v3300_v10 = vld [vmem:[#allocation31_spill] sm:$0xff]  ;;  %v3302_v7 = vld [vmem:[#allocation33_spill] sm:$0xff] }
 0x467   :  { %v3027_v51 = vrot.slane %v1219_v61, %v2619_v1  ;;  %v1230_v31 = vmul.f32 %v1223_v47, %v2699_v25  ;;  %v1231_v11 = vmul.f32 %v1223_v47, %v2702_v59  ;;  %v1232_v20 = vmul.f32 %v1223_v47, %v2721_v13 }
 0x468   :  { %v1233_v52 = vmul.f32 %v1223_v47, %v2734_v5  ;;  %v1234_v17 = vmul.f32 %v1223_v47, %v2746_v26  ;;  %v1235_v55 = vmul.f32 %v1223_v47, %v2758_v21  ;;  %v1236_v53 = vmul.f32 %v1223_v47, %v2770_v30 }
 0x469   :  { %v1237_v22 = vmul.f32 %v1223_v47, %v2782_v36  ;;  %v1238_v33 = vmul.f32 %v1223_v47, %v2794_v37  ;;  %v1239_v1 = vmul.f32 %v1223_v47, %v2806_v41  ;;  %v1240_v25 = vmul.f32 %v1223_v47, %v2818_v35  ;;  %1294 = vst [vmem:[#allocation5] sm:$0xff] %v1230_v31 }
 0x46a   :  { %1295 = vst [vmem:[#allocation5 + $0x8] sm:$0xff] %v1231_v11  ;;  %1296 = vst [vmem:[#allocation5 + $0x10] sm:$0xff] %v1232_v20  ;;  %v1241_v59 = vmul.f32 %v1223_v47, %v2830_v9  ;;  %v1242_v13 = vmul.f32 %v1223_v47, %v2842_v63  ;;  %v1243_v5 = vmul.f32 %v1223_v47, %v2854_v15  ;;  %v3304_v11 = vld [vmem:[#allocation35_spill] sm:$0xff] }
 0x46b   :  { %v1244_v26 = vmul.f32 %v1223_v47, %v2866_v12  ;;  %1297 = vst [vmem:[#allocation5 + $0x18] sm:$0xff] %v1233_v52  ;;  %1298 = vst [vmem:[#allocation5 + $0x20] sm:$0xff] %v1234_v17  ;;  %v1245_v21 = vmul.f32 %v1223_v47, %v2878_v42  ;;  %v1246_v30 = vmul.f32 %v1223_v47, %v2890_v56  ;;  %v3305_v52 = vld [vmem:[#allocation36_spill] sm:$0xff] }
 0x46c   :  { %1299 = vst [vmem:[#allocation5 + $0x28] sm:$0xff] %v1235_v55  ;;  %1300 = vst [vmem:[#allocation5 + $0x30] sm:$0xff] %v1236_v53  ;;  %v1247_v36 = vmul.f32 %v1223_v47, %v2902_v40  ;;  %v1248_v37 = vmul.f32 %v1223_v47, %v2914_v50  ;;  %v1249_v41 = vmul.f32 %v1223_v47, %v2926_v0  ;;  %v3306_v55 = vld [vmem:[#allocation37_spill] sm:$0xff] }
 0x46d   :  { %1301 = vst [vmem:[#allocation5 + $0x38] sm:$0xff] %v1237_v22  ;;  %1302 = vst [vmem:[#allocation5 + $0x40] sm:$0xff] %v1238_v33  ;;  %v1250_v35 = vmul.f32 %v1223_v47, %v2936_v60  ;;  %v1251_v9 = vmul.f32 %v1223_v47, %v2948_v8  ;;  %v1252_v63 = vmul.f32 %v1223_v47, %v2955_v43  ;;  %v3307_v22 = vld [vmem:[#allocation38_spill] sm:$0xff] }
 0x46e   :  { %1303 = vst [vmem:[#allocation5 + $0x48] sm:$0xff] %v1239_v1  ;;  %1304 = vst [vmem:[#allocation5 + $0x50] sm:$0xff] %v1240_v25  ;;  %v1253_v15 = vmul.f32 %v1223_v47, %v2964_v58  ;;  %v1254_v12 = vmul.f32 %v1223_v47, %v2971_v18  ;;  %v1255_v42 = vmul.f32 %v1223_v47, %v2977_v62  ;;  %v3295_v62 = vld [vmem:[#allocation19_spill] sm:$0xff]  ;;  %v3308_v1 = vld [vmem:[#allocation25_spill] sm:$0xff] }
 0x46f   :  { %1305 = vst [vmem:[#allocation5 + $0x58] sm:$0xff] %v1241_v59  ;;  %1306 = vst [vmem:[#allocation5 + $0x60] sm:$0xff] %v1242_v13  ;;  %v1256_v56 = vmul.f32 %v1223_v47, %v2983_v39  ;;  %v1257_v40 = vmul.f32 %v1223_v47, %v2989_v24  ;;  %v1258_v50 = vmul.f32 %v1223_v47, %v2995_v2  ;;  %v3309_v59 = vld [vmem:[#allocation8_spill] sm:$0xff] }
 0x470   :  { %1307 = vst [vmem:[#allocation5 + $0x68] sm:$0xff] %v1243_v5  ;;  %1308 = vst [vmem:[#allocation5 + $0x70] sm:$0xff] %v1244_v26  ;;  %v1259_v0 = vmul.f32 %v1223_v47, %v3001_v4  ;;  %v1260_v60 = vmul.f32 %v1223_v47, %v3005_v34  ;;  %v1261_v8 = vmul.f32 %v1223_v47, %v3009_v46  ;;  %v3303_v47 = vld [vmem:[#allocation34_spill] sm:$0xff]  ;;  %v3310_v5 = vld [vmem:[#allocation9_spill] sm:$0xff] }
 0x471   :  { %1309 = vst [vmem:[#allocation5 + $0x78] sm:$0xff] %v1245_v21  ;;  %1310 = vst [vmem:[#allocation5 + $0x80] sm:$0xff] %v1246_v30  ;;  %v1262_v43 = vmul.f32 %v3027_v51, %v2636_v6  ;;  %v1263_v39 = vmul.f32 %v3027_v51, %v2639_v29  ;;  %v1264_v24 = vmul.f32 %v3027_v51, %v2646_v57  ;;  %v3311_v21 = vld [vmem:[#allocation10_spill] sm:$0xff] }
 0x472   :  { %1311 = vst [vmem:[#allocation5 + $0x88] sm:$0xff] %v1247_v36  ;;  %1312 = vst [vmem:[#allocation5 + $0x90] sm:$0xff] %v1248_v37  ;;  %v1265_v4 = vmul.f32 %v3027_v51, %v2653_v27  ;;  %v1266_v2 = vmul.f32 %v3027_v51, %v2659_v14  ;;  %v1267_v58 = vmul.f32 %v3027_v51, %v2665_v16  ;;  %v3293_v14 = vld [vmem:[#allocation17_spill] sm:$0xff]  ;;  %v3294_v16 = vld [vmem:[#allocation18_spill] sm:$0xff] }
 0x473   :  { %1313 = vst [vmem:[#allocation5 + $0x98] sm:$0xff] %v1249_v41  ;;  %1314 = vst [vmem:[#allocation5 + $0xa0] sm:$0xff] %v1250_v35  ;;  %v1268_v6 = vmul.f32 %v3027_v51, %v2671_v49  ;;  %v1269_v29 = vmul.f32 %v3027_v51, %v2677_v19  ;;  %v1270_v57 = vmul.f32 %v3027_v51, %v2687_v3  ;;  %v3296_v19 = vld [vmem:[#allocation20_spill] sm:$0xff]  ;;  %v3297_v3 = vld [vmem:[#allocation21_spill] sm:$0xff] }
 0x474   :  { %1315 = vst [vmem:[#allocation5 + $0xa8] sm:$0xff] %v1251_v9  ;;  %1316 = vst [vmem:[#allocation5 + $0xb0] sm:$0xff] %v1252_v63  ;;  %v1271_v27 = vmul.f32 %v3027_v51, %v2693_v38  ;;  %v1272_v18 = vmul.f32 %v3027_v51, %v3293_v14  ;;  %v1273_v49 = vmul.f32 %v3027_v51, %v3294_v16  ;;  %v3298_v38 = vld [vmem:[#allocation22_spill] sm:$0xff]  ;;  %v3312_v36 = vld [vmem:[#allocation11_spill] sm:$0xff] }
 0x475   :  { %1317 = vst [vmem:[#allocation5 + $0xb8] sm:$0xff] %v1253_v15  ;;  %1318 = vst [vmem:[#allocation5 + $0xc0] sm:$0xff] %v1254_v12  ;;  %v1274_v34 = vmul.f32 %v3027_v51, %v3295_v62  ;;  %v1275_v46 = vmul.f32 %v3027_v51, %v3296_v19  ;;  %v1276_v32 = vmul.f32 %v3027_v51, %v3297_v3  ;;  %v3313_v41 = vld [vmem:[#allocation12_spill] sm:$0xff] }
 0x476   :  { %1319 = vst [vmem:[#allocation5 + $0xc8] sm:$0xff] %v1255_v42  ;;  %1320 = vst [vmem:[#allocation5 + $0xd0] sm:$0xff] %v1256_v56  ;;  %v1277_v45 = vmul.f32 %v3027_v51, %v3298_v38  ;;  %v1278_v48 = vmul.f32 %v3027_v51, %v3299_v23  ;;  %v1279_v44 = vmul.f32 %v3027_v51, %v3300_v10  ;;  %v3314_v9 = vld [vmem:[#allocation24_spill] sm:$0xff] }
 0x477   :  { %1321 = vst [vmem:[#allocation5 + $0xd8] sm:$0xff] %v1257_v40  ;;  %1322 = vst [vmem:[#allocation5 + $0xe0] sm:$0xff] %v1258_v50  ;;  %v1280_v28 = vmul.f32 %v3027_v51, %v3301_v54  ;;  %v1281_v61 = vmul.f32 %v3027_v51, %v3302_v7  ;;  %v1282_v31 = vmul.f32 %v3027_v51, %v3303_v47 }
 0x478   :  { %1323 = vst [vmem:[#allocation5 + $0xe8] sm:$0xff] %v1259_v0  ;;  %1324 = vst [vmem:[#allocation5 + $0xf0] sm:$0xff] %v1260_v60  ;;  %v1283_v20 = vmul.f32 %v3027_v51, %v3304_v11  ;;  %v1284_v17 = vmul.f32 %v3027_v51, %v3305_v52  ;;  %v1285_v53 = vmul.f32 %v3027_v51, %v3306_v55 }
 0x479   :  { %1325 = vst [vmem:[#allocation5 + $0xf8] sm:$0xff] %v1261_v8  ;;  %1326 = vst [vmem:[#allocation5 + $0x100] sm:$0xff] %v1262_v43  ;;  %v1286_v33 = vmul.f32 %v3027_v51, %v3307_v22  ;;  %v1287_v25 = vmul.f32 %v3027_v51, %v3308_v1  ;;  %v1288_v13 = vmul.f32 %v3027_v51, %v3309_v59 }
 0x47a   :  { %1327 = vst [vmem:[#allocation5 + $0x108] sm:$0xff] %v1263_v39  ;;  %1328 = vst [vmem:[#allocation5 + $0x110] sm:$0xff] %v1264_v24  ;;  %v1289_v26 = vmul.f32 %v3027_v51, %v3310_v5  ;;  %v1290_v30 = vmul.f32 %v3027_v51, %v3311_v21  ;;  %v1291_v37 = vmul.f32 %v3027_v51, %v3312_v36 }
 0x47b   :  { %1329 = vst [vmem:[#allocation5 + $0x118] sm:$0xff] %v1265_v4  ;;  %1330 = vst [vmem:[#allocation5 + $0x120] sm:$0xff] %v1266_v2  ;;  %v1292_v35 = vmul.f32 %v3027_v51, %v3313_v41  ;;  %v1293_v63 = vmul.f32 %v3027_v51, %v3314_v9 }
 0x47c   :  { %1331 = vst [vmem:[#allocation5 + $0x128] sm:$0xff] %v1267_v58  ;;  %1332 = vst [vmem:[#allocation5 + $0x130] sm:$0xff] %v1268_v6 }
 0x47d   :  { %1333 = vst [vmem:[#allocation5 + $0x138] sm:$0xff] %v1269_v29  ;;  %1334 = vst [vmem:[#allocation5 + $0x140] sm:$0xff] %v1270_v57 }
 0x47e   :  { %1335 = vst [vmem:[#allocation5 + $0x148] sm:$0xff] %v1271_v27  ;;  %1336 = vst [vmem:[#allocation5 + $0x150] sm:$0xff] %v1272_v18 }
 0x47f   :  { %1337 = vst [vmem:[#allocation5 + $0x158] sm:$0xff] %v1273_v49  ;;  %1338 = vst [vmem:[#allocation5 + $0x160] sm:$0xff] %v1274_v34 }
 0x480   :  { %1339 = vst [vmem:[#allocation5 + $0x168] sm:$0xff] %v1275_v46  ;;  %1340 = vst [vmem:[#allocation5 + $0x170] sm:$0xff] %v1276_v32 }
 0x481   :  { %1341 = vst [vmem:[#allocation5 + $0x178] sm:$0xff] %v1277_v45  ;;  %1342 = vst [vmem:[#allocation5 + $0x180] sm:$0xff] %v1278_v48 }
 0x482   :  { %1343 = vst [vmem:[#allocation5 + $0x188] sm:$0xff] %v1279_v44  ;;  %1344 = vst [vmem:[#allocation5 + $0x190] sm:$0xff] %v1280_v28 }
 0x483   :  { %1345 = vst [vmem:[#allocation5 + $0x198] sm:$0xff] %v1281_v61  ;;  %1346 = vst [vmem:[#allocation5 + $0x1a0] sm:$0xff] %v1282_v31 }
 0x484   :  { %1347 = vst [vmem:[#allocation5 + $0x1a8] sm:$0xff] %v1283_v20  ;;  %1348 = vst [vmem:[#allocation5 + $0x1b0] sm:$0xff] %v1284_v17 }
 0x485   :  { %1349 = vst [vmem:[#allocation5 + $0x1b8] sm:$0xff] %v1285_v53  ;;  %1350 = vst [vmem:[#allocation5 + $0x1c0] sm:$0xff] %v1286_v33 }
 0x486   :  { %1351 = vst [vmem:[#allocation5 + $0x1c8] sm:$0xff] %v1287_v25  ;;  %1352 = vst [vmem:[#allocation5 + $0x1d0] sm:$0xff] %v1288_v13 }
 0x487   :  { %1353 = vst [vmem:[#allocation5 + $0x1d8] sm:$0xff] %v1289_v26  ;;  %1354 = vst [vmem:[#allocation5 + $0x1e0] sm:$0xff] %v1290_v30 }
 0x488   :  { %1355 = vst [vmem:[#allocation5 + $0x1e8] sm:$0xff] %v1291_v37  ;;  %1356 = vst [vmem:[#allocation5 + $0x1f0] sm:$0xff] %v1292_v35 }
 0x489   :  { %1357 = vst [vmem:[#allocation5 + $0x1f8] sm:$0xff] %v1293_v63 }
 0x48a   :  { %1765 = shalt.err (!%p1762_p12)
}
 0x48b   :  { %s1766_s12 = scalar_lea.hbm %s3149_s9, 8192 }
 0x48c   :  { %p1767_p13 = scmp.ne.s32.totalorder %s3149_s9, %s1766_s12  ;;  %p1770_p0 = scmp.lt.u32.totalorder %s1766_s12, %s3149_s9 }
 0x48e   :  { %p1772_p1 = pnand %p1770_p0, %p1767_p13 }
 0x490   :  { %1775 = shalt.err (!%p1772_p1)
}
 0x491   :  { %1369 = dma.vmem_to_hbm [thread:$0]  %s1364_s7, 8192, %s3149_s9, [#allocation4], %s1781_s19, %s1781_s19, %s1782_s20  }
 0x492   :  { %1778 = dma.done.wait [#allocation4], 8192  }
 0x493   :  { %1779 = vsyncadd [#allocation4], 4294959104 }
 0x494   :  { %1373 = vsyncpa [#allocation3], 1 }
 0x495   :  { %1374 = vsyncpa [#allocation4], 1 }

</bundles_post_ra>
